<compile_context>
chip_gen: v6e
topology: v6e:2x2x1
jax: 0.10.0
libtpu: 0.0.40
codegen_flags: <defaults>
</compile_context>

<pallas_src>
import functools

import jax
import jax.numpy as jnp
import numpy as np
from jax.experimental import pallas as pl
from jax.experimental.pallas import tpu as pltpu

EPS = 1e-5        # nn.BatchNorm2d default eps
LANE = 128        # pad output channels to a multiple of 128 -> lane-dense, unmasked stores
TM_MAX = 512      # M-tile (im2col rows): ~85% of HBM roofline per the tile sweep, and small
                  # enough to double-buffer comfortably inside v7x's 64 MiB VMEM budget.


def _round_up(x, m):
    return (x + m - 1) // m * m


# ---------------------------------------------------------------------------
# Phase-1 kernels: bf16 GEMM (f32 accumulation on the MXU) + per-tile partial
# BatchNorm statistics.  Partial stats are reduced across tiles in (tiny) JAX
# so the batch statistics stay global over M.
# ---------------------------------------------------------------------------
def _gemm_stats_kernel(p_ref, w_ref, y_ref, s_ref, q_ref):
    y = jnp.dot(p_ref[...], w_ref[...], preferred_element_type=jnp.float32)
    y_ref[...] = y
    # lane-dense per-lane (cross-sublane) reductions over the tile's rows
    s_ref[...] = jnp.sum(y, axis=0, keepdims=True).reshape(1, 1, y.shape[1])
    q_ref[...] = jnp.sum(y * y, axis=0, keepdims=True).reshape(1, 1, y.shape[1])


def _dual_gemm_stats_kernel(p_ref, w_ref, pd_ref, wd_ref,
                            y_ref, yd_ref, s_ref, q_ref, sd_ref, qd_ref):
    # conv2 GEMM + the tiny 1x1 downsample GEMM fused in the same pass (shared M rows).
    y = jnp.dot(p_ref[...], w_ref[...], preferred_element_type=jnp.float32)
    yd = jnp.dot(pd_ref[...], wd_ref[...], preferred_element_type=jnp.float32)
    y_ref[...] = y
    yd_ref[...] = yd
    s_ref[...] = jnp.sum(y, axis=0, keepdims=True).reshape(1, 1, y.shape[1])
    q_ref[...] = jnp.sum(y * y, axis=0, keepdims=True).reshape(1, 1, y.shape[1])
    sd_ref[...] = jnp.sum(yd, axis=0, keepdims=True).reshape(1, 1, yd.shape[1])
    qd_ref[...] = jnp.sum(yd * yd, axis=0, keepdims=True).reshape(1, 1, yd.shape[1])


# ---------------------------------------------------------------------------
# Phase-2 kernels: folded BN affine (single FMA), optional residual (with its
# own folded affine), ReLU.  Lane-dense output aliased onto the GEMM buffer.
# ---------------------------------------------------------------------------
def _apply_kernel(y_ref, sc_ref, sh_ref, o_ref):
    o_ref[...] = jnp.maximum(y_ref[...] * sc_ref[...] + sh_ref[...], 0.0)


def _apply_res_kernel(y_ref, sc_ref, sh_ref, r_ref, rsc_ref, rsh_ref, o_ref):
    out = y_ref[...] * sc_ref[...] + sh_ref[...]
    out = out + r_ref[...] * rsc_ref[...] + rsh_ref[...]
    o_ref[...] = jnp.maximum(out, 0.0)


# ---------------------------------------------------------------------------
# pallas_call wrappers
# ---------------------------------------------------------------------------
def _compiler_params():
    # Independent M-tiles -> "parallel".
    return pltpu.CompilerParams(dimension_semantics=("parallel",))


def _gemm_stats(p, w, tm):
    mp, kp = p.shape
    cp = w.shape[1]
    gm = mp // tm
    y, s, q = pl.pallas_call(
        _gemm_stats_kernel,
        out_shape=(jax.ShapeDtypeStruct((mp, cp), jnp.float32),
                   jax.ShapeDtypeStruct((gm, 1, cp), jnp.float32),
                   jax.ShapeDtypeStruct((gm, 1, cp), jnp.float32)),
        grid=(gm,),
        in_specs=[pl.BlockSpec((tm, kp), lambda i: (i, 0)),
                  pl.BlockSpec((kp, cp), lambda i: (0, 0))],
        out_specs=(pl.BlockSpec((tm, cp), lambda i: (i, 0)),
                   pl.BlockSpec((1, 1, cp), lambda i: (i, 0, 0)),
                   pl.BlockSpec((1, 1, cp), lambda i: (i, 0, 0))),
        compiler_params=_compiler_params(),
    )(p, w)
    return y, jnp.sum(s, axis=(0, 1)), jnp.sum(q, axis=(0, 1))


def _dual_gemm_stats(p, w, pd, wd, tm):
    mp, kp = p.shape
    kd = pd.shape[1]
    cp = w.shape[1]
    gm = mp // tm
    y, yd, s, q, sd, qd = pl.pallas_call(
        _dual_gemm_stats_kernel,
        out_shape=(jax.ShapeDtypeStruct((mp, cp), jnp.float32),
                   jax.ShapeDtypeStruct((mp, cp), jnp.float32),
                   jax.ShapeDtypeStruct((gm, 1, cp), jnp.float32),
                   jax.ShapeDtypeStruct((gm, 1, cp), jnp.float32),
                   jax.ShapeDtypeStruct((gm, 1, cp), jnp.float32),
                   jax.ShapeDtypeStruct((gm, 1, cp), jnp.float32)),
        grid=(gm,),
        in_specs=[pl.BlockSpec((tm, kp), lambda i: (i, 0)),
                  pl.BlockSpec((kp, cp), lambda i: (0, 0)),
                  pl.BlockSpec((tm, kd), lambda i: (i, 0)),
                  pl.BlockSpec((kd, cp), lambda i: (0, 0))],
        out_specs=(pl.BlockSpec((tm, cp), lambda i: (i, 0)),
                   pl.BlockSpec((tm, cp), lambda i: (i, 0)),
                   pl.BlockSpec((1, 1, cp), lambda i: (i, 0, 0)),
                   pl.BlockSpec((1, 1, cp), lambda i: (i, 0, 0)),
                   pl.BlockSpec((1, 1, cp), lambda i: (i, 0, 0)),
                   pl.BlockSpec((1, 1, cp), lambda i: (i, 0, 0))),
        compiler_params=_compiler_params(),
    )(p, w, pd, wd)
    return (y, yd, jnp.sum(s, axis=(0, 1)), jnp.sum(q, axis=(0, 1)),
            jnp.sum(sd, axis=(0, 1)), jnp.sum(qd, axis=(0, 1)))


def _bn_apply_relu(y, scale, shift, tm):
    mp, cp = y.shape
    gm = mp // tm
    return pl.pallas_call(
        _apply_kernel,
        out_shape=jax.ShapeDtypeStruct((mp, cp), jnp.float32),
        grid=(gm,),
        in_specs=[pl.BlockSpec((tm, cp), lambda i: (i, 0)),
                  pl.BlockSpec((1, cp), lambda i: (0, 0)),
                  pl.BlockSpec((1, cp), lambda i: (0, 0))],
        out_specs=pl.BlockSpec((tm, cp), lambda i: (i, 0)),
        input_output_aliases={0: 0},           # reuse the GEMM output buffer
        compiler_params=_compiler_params(),
    )(y, scale, shift)


def _bn_apply_add_relu(y, scale, shift, res, rscale, rshift, tm):
    mp, cp = y.shape
    gm = mp // tm
    return pl.pallas_call(
        _apply_res_kernel,
        out_shape=jax.ShapeDtypeStruct((mp, cp), jnp.float32),
        grid=(gm,),
        in_specs=[pl.BlockSpec((tm, cp), lambda i: (i, 0)),
                  pl.BlockSpec((1, cp), lambda i: (0, 0)),
                  pl.BlockSpec((1, cp), lambda i: (0, 0)),
                  pl.BlockSpec((tm, cp), lambda i: (i, 0)),
                  pl.BlockSpec((1, cp), lambda i: (0, 0)),
                  pl.BlockSpec((1, cp), lambda i: (0, 0))],
        out_specs=pl.BlockSpec((tm, cp), lambda i: (i, 0)),
        input_output_aliases={0: 0},
        compiler_params=_compiler_params(),
    )(y, scale, shift, res, rscale, rshift)


# ---------------------------------------------------------------------------
# JAX-side glue
# ---------------------------------------------------------------------------
def _fold_bn(ssum, ssq, m, gamma_p, beta_p):
    # BN affine folded into one FMA: scale = gamma*rsqrt(var+eps), shift = beta - mean*scale.
    mean = ssum / m
    var = jnp.maximum(ssq / m - mean * mean, 0.0)
    scale = gamma_p * jax.lax.rsqrt(var + EPS)
    shift = beta_p - mean * scale
    return scale.reshape(1, -1), shift.reshape(1, -1)


def _prep_weight(w_oihw, k_pad, c_pad):
    # PyTorch [Cout, Cin, kh, kw] -> [kh*kw*Cin, Cout], zero-padded to [k_pad, c_pad], bf16.
    cout = w_oihw.shape[0]
    wf = jnp.transpose(w_oihw, (2, 3, 1, 0)).reshape(-1, cout)
    wf = jnp.pad(wf, ((0, k_pad - wf.shape[0]), (0, c_pad - cout)))
    return wf.astype(jnp.bfloat16)


def _patches(x_nhwc, k, stride, pad, mp):
    # TODO(synk): move im2col in-kernel (shifted-window / halo BlockSpecs over the kh*kw
    # taps) to avoid the kh*kw x HBM read amplification on large feature maps.
    n, h, w, c = x_nhwc.shape
    xp = jnp.pad(x_nhwc, ((0, 0), (pad, pad), (pad, pad), (0, 0)))
    ho = (h + 2 * pad - k) // stride + 1
    wo = (w + 2 * pad - k) // stride + 1
    cols = []
    for di in range(k):
        for dj in range(k):
            cols.append(xp[:, di:di + stride * ho:stride, dj:dj + stride * wo:stride, :])
    p = jnp.stack(cols, axis=3).reshape(n * ho * wo, k * k * c)
    kp = _round_up(k * k * c, 8)
    p = jnp.pad(p, ((0, mp - p.shape[0]), (0, kp - k * k * c)))
    return p.astype(jnp.bfloat16)


def basic_block(x_nhwc, prm, *, k, stride, pad):
    n, h, w, cin = x_nhwc.shape
    cout = prm["w1"].shape[0]
    cp = _round_up(cout, LANE)

    ho = (h + 2 * pad - k) // stride + 1
    wo = (w + 2 * pad - k) // stride + 1
    m = n * ho * wo
    tm = min(TM_MAX, _round_up(m, 8))
    mp = _round_up(m, tm)

    def gpad(v):
        return jnp.pad(v.astype(jnp.float32), (0, cp - cout))

    # ---- conv1 -> bn1 -> relu -------------------------------------------------
    p1 = _patches(x_nhwc, k, stride, pad, mp)
    w1 = _prep_weight(prm["w1"], p1.shape[1], cp)
    y1, s1, q1 = _gemm_stats(p1, w1, tm)
    sc1, sh1 = _fold_bn(s1, q1, m, gpad(prm["g1"]), gpad(prm["b1"]))
    a1_full = _bn_apply_relu(y1, sc1, sh1, tm)
    a1 = a1_full[:m, :cout].reshape(n, ho, wo, cout)

    # ---- conv2 -> bn2 (+ residual) -> relu -------------------------------------
    p2 = _patches(a1, k, 1, pad, mp)
    w2 = _prep_weight(prm["w2"], p2.shape[1], cp)

    if stride > 1:
        # downsample: 1x1 stride-s conv == strided subsample + GEMM, fused into conv2's
        # phase-1 kernel; its BN-apply is fused into the residual phase-2 kernel.
        xs = x_nhwc[:, ::stride, ::stride, :]
        assert xs.shape[1] == ho and xs.shape[2] == wo
        xs = xs.reshape(-1, cin)
        kd = _round_up(cin, 8)
        pd = jnp.pad(xs, ((0, mp - m), (0, kd - cin))).astype(jnp.bfloat16)
        wd = _prep_weight(prm["wds"], kd, cp)
        y2, yd, s2, q2, sd, qd = _dual_gemm_stats(p2, w2, pd, wd, tm)
        sc2, sh2 = _fold_bn(s2, q2, m, gpad(prm["g2"]), gpad(prm["b2"]))
        scd, shd = _fold_bn(sd, qd, m, gpad(prm["gds"]), gpad(prm["bds"]))
        out_full = _bn_apply_add_relu(y2, sc2, sh2, yd, scd, shd, tm)
    else:
        assert cin == cout, "identity residual requires in_planes == out_planes"
        assert (ho, wo) == (h, w)
        y2, s2, q2 = _gemm_stats(p2, w2, tm)
        sc2, sh2 = _fold_bn(s2, q2, m, gpad(prm["g2"]), gpad(prm["b2"]))
        res = jnp.pad(x_nhwc.reshape(-1, cin).astype(jnp.float32),
                      ((0, mp - m), (0, cp - cin)))
        ident = jnp.ones((1, cp), jnp.float32)
        zero = jnp.zeros((1, cp), jnp.float32)
        out_full = _bn_apply_add_relu(y2, sc2, sh2, res, ident, zero, tm)

    return out_full[:m, :cout].reshape(n, ho, wo, cout)


def encoder_forward(x_nchw, params, *, kernel_size, stride, padding):
    # NOTE: groups=1, bias=False only (the module's defaults).
    x = jnp.transpose(x_nchw, (0, 2, 3, 1)).astype(jnp.float32)     # NHWC
    a = basic_block(x, params["block1"], k=kernel_size, stride=stride, pad=padding)
    b = basic_block(a, params["block2"], k=kernel_size, stride=1, pad=padding)
    return jnp.transpose(b, (0, 3, 1, 2))                            # back to NCHW


# ---------------------------------------------------------------------------
# Pure-JAX reference (bf16 conv operands / f32 accumulation, like the kernel).
# ---------------------------------------------------------------------------
def _ref_conv(x, w, s, p):
    return jax.lax.conv_general_dilated(
        x.astype(jnp.bfloat16), w.astype(jnp.bfloat16), (s, s), [(p, p), (p, p)],
        dimension_numbers=("NCHW", "OIHW", "NCHW"),
        preferred_element_type=jnp.float32)


def _ref_bn(y, g, b):
    mean = y.mean(axis=(0, 2, 3), keepdims=True)
    var = ((y - mean) ** 2).mean(axis=(0, 2, 3), keepdims=True)
    return ((y - mean) * jax.lax.rsqrt(var + EPS) * g.reshape(1, -1, 1, 1)
            + b.reshape(1, -1, 1, 1))


def _ref_block(x, prm, k, s, p):
    out = jax.nn.relu(_ref_bn(_ref_conv(x, prm["w1"], s, p), prm["g1"], prm["b1"]))
    out = _ref_bn(_ref_conv(out, prm["w2"], 1, p), prm["g2"], prm["b2"])
    if s > 1:
        res = _ref_bn(_ref_conv(x, prm["wds"], s, 0), prm["gds"], prm["bds"])
    else:
        res = x
    return jax.nn.relu(out + res)


def ref_encoder(x, params, *, k, s, p):
    a = _ref_block(x, params["block1"], k, s, p)
    return _ref_block(a, params["block2"], k, 1, p)


if __name__ == "__main__":
    # Encoder(in_planes=4, out_planes=8, kernel_size=3, stride=2, padding=1)
    N, CIN, COUT, H, W = 2, 4, 8, 16, 16
    K, STRIDE, PAD = 3, 2, 1

    ks = jax.random.split(jax.random.PRNGKey(0), 16)
    params = {
        "block1": {
            "w1": 0.1 * jax.random.normal(ks[0], (COUT, CIN, K, K), jnp.float32),
            "g1": 1.0 + 0.1 * jax.random.normal(ks[1], (COUT,), jnp.float32),
            "b1": 0.1 * jax.random.normal(ks[2], (COUT,), jnp.float32),
            "w2": 0.1 * jax.random.normal(ks[3], (COUT, COUT, K, K), jnp.float32),
            "g2": 1.0 + 0.1 * jax.random.normal(ks[4], (COUT,), jnp.float32),
            "b2": 0.1 * jax.random.normal(ks[5], (COUT,), jnp.float32),
            "wds": 0.1 * jax.random.normal(ks[6], (COUT, CIN, 1, 1), jnp.float32),
            "gds": 1.0 + 0.1 * jax.random.normal(ks[7], (COUT,), jnp.float32),
            "bds": 0.1 * jax.random.normal(ks[8], (COUT,), jnp.float32),
        },
        "block2": {
            "w1": 0.1 * jax.random.normal(ks[9], (COUT, COUT, K, K), jnp.float32),
            "g1": 1.0 + 0.1 * jax.random.normal(ks[10], (COUT,), jnp.float32),
            "b1": 0.1 * jax.random.normal(ks[11], (COUT,), jnp.float32),
            "w2": 0.1 * jax.random.normal(ks[12], (COUT, COUT, K, K), jnp.float32),
            "g2": 1.0 + 0.1 * jax.random.normal(ks[13], (COUT,), jnp.float32),
            "b2": 0.1 * jax.random.normal(ks[14], (COUT,), jnp.float32),
        },
    }
    x = jax.random.normal(ks[15], (N, CIN, H, W), jnp.float32)

    fwd = jax.jit(functools.partial(encoder_forward,
                                    kernel_size=K, stride=STRIDE, padding=PAD))
    out = fwd(x, params)
    jax.block_until_ready(out)

    assert out.shape == (N, COUT, H // STRIDE, W // STRIDE), out.shape
    ref = ref_encoder(x, params, k=K, s=STRIDE, p=PAD)
    # tolerance accounts for bf16 MXU operands (accumulation stays f32)
    np.testing.assert_allclose(np.asarray(out), np.asarray(ref), rtol=1e-2, atol=1e-2)

    print("KERNEL_OK")
</pallas_src>

<mosaic_0001>
module attributes {stable_mosaic.version = 11 : i64} {
  func.func @_gemm_stats_kernel(%arg0: i32, %arg1: memref<128x40xbf16, #tpu.memory_space<vmem>>, %arg2: memref<40x128xbf16, #tpu.memory_space<vmem>>, %arg3: memref<128x128xf32, #tpu.memory_space<vmem>>, %arg4: memref<1x1x128xf32, #tpu.memory_space<vmem>>, %arg5: memref<1x1x128xf32, #tpu.memory_space<vmem>>) attributes {dimension_semantics = [#tpu.dimension_semantics<parallel>], iteration_bounds = array<i64: 1>, scalar_prefetch = 0 : i64, scratch_operands = 0 : i64, tpu.core_type = #tpu.core_type<tc>, window_params = [{transform_indices = @transform_0, window_bounds = array<i64: 128, 40>}, {pipeline_mode = #tpu.pipeline_mode<synchronous>, transform_indices = @transform_1, window_bounds = array<i64: 40, 128>}, {transform_indices = @transform_2, window_bounds = array<i64: 128, 128>}, {transform_indices = @transform_3, window_bounds = array<i64: 1, 1, 128>}, {transform_indices = @transform_4, window_bounds = array<i64: 1, 1, 128>}]} {
    %c0 = arith.constant 0 : index
    %c0_0 = arith.constant 0 : index
    %0 = vector.load %arg1[%c0, %c0_0] : memref<128x40xbf16, #tpu.memory_space<vmem>>, vector<128x40xbf16>
    %c0_1 = arith.constant 0 : index
    %c0_2 = arith.constant 0 : index
    %1 = vector.load %arg2[%c0_1, %c0_2] : memref<40x128xbf16, #tpu.memory_space<vmem>>, vector<40x128xbf16>
    %cst = arith.constant dense<0.000000e+00> : vector<128x128xf32>
    %2 = tpu.matmul %0, %1, %cst {dimension_numbers = #tpu.dot_dimension_numbers<[1], [0], [0], [1], [0, 0, 1, 1], [], []>} : vector<128x40xbf16>, vector<40x128xbf16>, vector<128x128xf32> -> vector<128x128xf32>
    %c0_3 = arith.constant 0 : index
    %c0_4 = arith.constant 0 : index
    %3 = vector.load %arg3[%c0_3, %c0_4] : memref<128x128xf32, #tpu.memory_space<vmem>>, vector<128x128xf32>
    tpu.vector_store %arg3[%c0_3, %c0_4], %2 {strides = array<i32>} : memref<128x128xf32, #tpu.memory_space<vmem>>, vector<128x128xf32>,
    %cst_5 = arith.constant dense<0.000000e+00> : vector<128xf32>
    %4 = vector.multi_reduction <add>, %2, %cst_5 [0] : vector<128x128xf32> to vector<128xf32>
    %5 = vector.shape_cast %4 : vector<128xf32> to vector<1x128xf32>
    %6 = vector.shape_cast %5 : vector<1x128xf32> to vector<1x1x128xf32>
    %c0_6 = arith.constant 0 : index
    %c0_7 = arith.constant 0 : index
    %c0_8 = arith.constant 0 : index
    %7 = vector.load %arg4[%c0_6, %c0_7, %c0_8] : memref<1x1x128xf32, #tpu.memory_space<vmem>>, vector<1x1x128xf32>
    tpu.vector_store %arg4[%c0_6, %c0_7, %c0_8], %6 {strides = array<i32>} : memref<1x1x128xf32, #tpu.memory_space<vmem>>, vector<1x1x128xf32>,
    %8 = arith.mulf %2, %2 : vector<128x128xf32>
    %cst_9 = arith.constant dense<0.000000e+00> : vector<128xf32>
    %9 = vector.multi_reduction <add>, %8, %cst_9 [0] : vector<128x128xf32> to vector<128xf32>
    %10 = vector.shape_cast %9 : vector<128xf32> to vector<1x128xf32>
    %11 = vector.shape_cast %10 : vector<1x128xf32> to vector<1x1x128xf32>
    %c0_10 = arith.constant 0 : index
    %c0_11 = arith.constant 0 : index
    %c0_12 = arith.constant 0 : index
    %12 = vector.load %arg5[%c0_10, %c0_11, %c0_12] : memref<1x1x128xf32, #tpu.memory_space<vmem>>, vector<1x1x128xf32>
    tpu.vector_store %arg5[%c0_10, %c0_11, %c0_12], %11 {strides = array<i32>} : memref<1x1x128xf32, #tpu.memory_space<vmem>>, vector<1x1x128xf32>,
    return
  }
  func.func @transform_0(%arg0: i32) -> (i32, i32) {
    %c0_i32 = arith.constant 0 : i32
    %c0_i32_0 = arith.constant 0 : i32
    return %arg0, %c0_i32 : i32, i32
  }
  func.func @transform_1(%arg0: i32) -> (i32, i32) {
    %c0_i32 = arith.constant 0 : i32
    %c0_i32_0 = arith.constant 0 : i32
    %c0_i32_1 = arith.constant 0 : i32
    return %c0_i32, %c0_i32_0 : i32, i32
  }
  func.func @transform_2(%arg0: i32) -> (i32, i32) {
    %c0_i32 = arith.constant 0 : i32
    %c0_i32_0 = arith.constant 0 : i32
    return %arg0, %c0_i32 : i32, i32
  }
  func.func @transform_3(%arg0: i32) -> (i32, i32, i32) {
    %c0_i32 = arith.constant 0 : i32
    %c0_i32_0 = arith.constant 0 : i32
    %c0_i32_1 = arith.constant 0 : i32
    return %arg0, %c0_i32, %c0_i32_0 : i32, i32, i32
  }
  func.func @transform_4(%arg0: i32) -> (i32, i32, i32) {
    %c0_i32 = arith.constant 0 : i32
    %c0_i32_0 = arith.constant 0 : i32
    %c0_i32_1 = arith.constant 0 : i32
    return %arg0, %c0_i32, %c0_i32_0 : i32, i32, i32
  }
}

module attributes {stable_mosaic.version = 11 : i64} {
  func.func @_apply_kernel(%arg0: i32, %arg1: memref<128x128xf32, #tpu.memory_space<vmem>>, %arg2: memref<1x128xf32, #tpu.memory_space<vmem>>, %arg3: memref<1x128xf32, #tpu.memory_space<vmem>>, %arg4: memref<128x128xf32, #tpu.memory_space<vmem>>) attributes {dimension_semantics = [#tpu.dimension_semantics<parallel>], iteration_bounds = array<i64: 1>, scalar_prefetch = 0 : i64, scratch_operands = 0 : i64, tpu.core_type = #tpu.core_type<tc>, window_params = [{transform_indices = @transform_0, window_bounds = array<i64: 128, 128>}, {pipeline_mode = #tpu.pipeline_mode<synchronous>, transform_indices = @transform_1, window_bounds = array<i64: 1, 128>}, {pipeline_mode = #tpu.pipeline_mode<synchronous>, transform_indices = @transform_2, window_bounds = array<i64: 1, 128>}, {transform_indices = @transform_3, window_bounds = array<i64: 128, 128>}]} {
    %c0 = arith.constant 0 : index
    %c0_0 = arith.constant 0 : index
    %0 = vector.load %arg1[%c0, %c0_0] : memref<128x128xf32, #tpu.memory_space<vmem>>, vector<128x128xf32>
    %c0_1 = arith.constant 0 : index
    %c0_2 = arith.constant 0 : index
    %1 = vector.load %arg2[%c0_1, %c0_2] : memref<1x128xf32, #tpu.memory_space<vmem>>, vector<1x128xf32>
    %2 = vector.broadcast %1 : vector<1x128xf32> to vector<128x128xf32>
    %3 = arith.mulf %0, %2 : vector<128x128xf32>
    %c0_3 = arith.constant 0 : index
    %c0_4 = arith.constant 0 : index
    %4 = vector.load %arg3[%c0_3, %c0_4] : memref<1x128xf32, #tpu.memory_space<vmem>>, vector<1x128xf32>
    %5 = vector.broadcast %4 : vector<1x128xf32> to vector<128x128xf32>
    %6 = arith.addf %3, %5 : vector<128x128xf32>
    %cst = arith.constant 0.000000e+00 : f32
    %7 = vector.broadcast %cst : f32 to vector<128x128xf32>
    %8 = arith.maximumf %6, %7 : vector<128x128xf32>
    %c0_5 = arith.constant 0 : index
    %c0_6 = arith.constant 0 : index
    %9 = vector.load %arg4[%c0_5, %c0_6] : memref<128x128xf32, #tpu.memory_space<vmem>>, vector<128x128xf32>
    tpu.vector_store %arg4[%c0_5, %c0_6], %8 {strides = array<i32>} : memref<128x128xf32, #tpu.memory_space<vmem>>, vector<128x128xf32>,
    return
  }
  func.func @transform_0(%arg0: i32) -> (i32, i32) {
    %c0_i32 = arith.constant 0 : i32
    %c0_i32_0 = arith.constant 0 : i32
    return %arg0, %c0_i32 : i32, i32
  }
  func.func @transform_1(%arg0: i32) -> (i32, i32) {
    %c0_i32 = arith.constant 0 : i32
    %c0_i32_0 = arith.constant 0 : i32
    %c0_i32_1 = arith.constant 0 : i32
    return %c0_i32, %c0_i32_0 : i32, i32
  }
  func.func @transform_2(%arg0: i32) -> (i32, i32) {
    %c0_i32 = arith.constant 0 : i32
    %c0_i32_0 = arith.constant 0 : i32
    %c0_i32_1 = arith.constant 0 : i32
    return %c0_i32, %c0_i32_0 : i32, i32
  }
  func.func @transform_3(%arg0: i32) -> (i32, i32) {
    %c0_i32 = arith.constant 0 : i32
    %c0_i32_0 = arith.constant 0 : i32
    return %arg0, %c0_i32 : i32, i32
  }
}

module attributes {stable_mosaic.version = 11 : i64} {
  func.func @_dual_gemm_stats_kernel(%arg0: i32, %arg1: memref<128x72xbf16, #tpu.memory_space<vmem>>, %arg2: memref<72x128xbf16, #tpu.memory_space<vmem>>, %arg3: memref<128x8xbf16, #tpu.memory_space<vmem>>, %arg4: memref<8x128xbf16, #tpu.memory_space<vmem>>, %arg5: memref<128x128xf32, #tpu.memory_space<vmem>>, %arg6: memref<128x128xf32, #tpu.memory_space<vmem>>, %arg7: memref<1x1x128xf32, #tpu.memory_space<vmem>>, %arg8: memref<1x1x128xf32, #tpu.memory_space<vmem>>, %arg9: memref<1x1x128xf32, #tpu.memory_space<vmem>>, %arg10: memref<1x1x128xf32, #tpu.memory_space<vmem>>) attributes {dimension_semantics = [#tpu.dimension_semantics<parallel>], iteration_bounds = array<i64: 1>, scalar_prefetch = 0 : i64, scratch_operands = 0 : i64, tpu.core_type = #tpu.core_type<tc>, window_params = [{transform_indices = @transform_0, window_bounds = array<i64: 128, 72>}, {pipeline_mode = #tpu.pipeline_mode<synchronous>, transform_indices = @transform_1, window_bounds = array<i64: 72, 128>}, {transform_indices = @transform_2, window_bounds = array<i64: 128, 8>}, {pipeline_mode = #tpu.pipeline_mode<synchronous>, transform_indices = @transform_3, window_bounds = array<i64: 8, 128>}, {transform_indices = @transform_4, window_bounds = array<i64: 128, 128>}, {transform_indices = @transform_5, window_bounds = array<i64: 128, 128>}, {transform_indices = @transform_6, window_bounds = array<i64: 1, 1, 128>}, {transform_indices = @transform_7, window_bounds = array<i64: 1, 1, 128>}, {transform_indices = @transform_8, window_bounds = array<i64: 1, 1, 128>}, {transform_indices = @transform_9, window_bounds = array<i64: 1, 1, 128>}]} {
    %c0 = arith.constant 0 : index
    %c0_0 = arith.constant 0 : index
    %0 = vector.load %arg1[%c0, %c0_0] : memref<128x72xbf16, #tpu.memory_space<vmem>>, vector<128x72xbf16>
    %c0_1 = arith.constant 0 : index
    %c0_2 = arith.constant 0 : index
    %1 = vector.load %arg2[%c0_1, %c0_2] : memref<72x128xbf16, #tpu.memory_space<vmem>>, vector<72x128xbf16>
    %cst = arith.constant dense<0.000000e+00> : vector<128x128xf32>
    %2 = tpu.matmul %0, %1, %cst {dimension_numbers = #tpu.dot_dimension_numbers<[1], [0], [0], [1], [0, 0, 1, 1], [], []>} : vector<128x72xbf16>, vector<72x128xbf16>, vector<128x128xf32> -> vector<128x128xf32>
    %c0_3 = arith.constant 0 : index
    %c0_4 = arith.constant 0 : index
    %3 = vector.load %arg3[%c0_3, %c0_4] : memref<128x8xbf16, #tpu.memory_space<vmem>>, vector<128x8xbf16>
    %c0_5 = arith.constant 0 : index
    %c0_6 = arith.constant 0 : index
    %4 = vector.load %arg4[%c0_5, %c0_6] : memref<8x128xbf16, #tpu.memory_space<vmem>>, vector<8x128xbf16>
    %cst_7 = arith.constant dense<0.000000e+00> : vector<128x128xf32>
    %5 = tpu.matmul %3, %4, %cst_7 {dimension_numbers = #tpu.dot_dimension_numbers<[1], [0], [0], [1], [0, 0, 1, 1], [], []>} : vector<128x8xbf16>, vector<8x128xbf16>, vector<128x128xf32> -> vector<128x128xf32>
    %c0_8 = arith.constant 0 : index
    %c0_9 = arith.constant 0 : index
    %6 = vector.load %arg5[%c0_8, %c0_9] : memref<128x128xf32, #tpu.memory_space<vmem>>, vector<128x128xf32>
    tpu.vector_store %arg5[%c0_8, %c0_9], %2 {strides = array<i32>} : memref<128x128xf32, #tpu.memory_space<vmem>>, vector<128x128xf32>,
    %c0_10 = arith.constant 0 : index
    %c0_11 = arith.constant 0 : index
    %7 = vector.load %arg6[%c0_10, %c0_11] : memref<128x128xf32, #tpu.memory_space<vmem>>, vector<128x128xf32>
    tpu.vector_store %arg6[%c0_10, %c0_11], %5 {strides = array<i32>} : memref<128x128xf32, #tpu.memory_space<vmem>>, vector<128x128xf32>,
    %cst_12 = arith.constant dense<0.000000e+00> : vector<128xf32>
    %8 = vector.multi_reduction <add>, %2, %cst_12 [0] : vector<128x128xf32> to vector<128xf32>
    %9 = vector.shape_cast %8 : vector<128xf32> to vector<1x128xf32>
    %10 = vector.shape_cast %9 : vector<1x128xf32> to vector<1x1x128xf32>
    %c0_13 = arith.constant 0 : index
    %c0_14 = arith.constant 0 : index
    %c0_15 = arith.constant 0 : index
    %11 = vector.load %arg7[%c0_13, %c0_14, %c0_15] : memref<1x1x128xf32, #tpu.memory_space<vmem>>, vector<1x1x128xf32>
    tpu.vector_store %arg7[%c0_13, %c0_14, %c0_15], %10 {strides = array<i32>} : memref<1x1x128xf32, #tpu.memory_space<vmem>>, vector<1x1x128xf32>,
    %12 = arith.mulf %2, %2 : vector<128x128xf32>
    %cst_16 = arith.constant dense<0.000000e+00> : vector<128xf32>
    %13 = vector.multi_reduction <add>, %12, %cst_16 [0] : vector<128x128xf32> to vector<128xf32>
    %14 = vector.shape_cast %13 : vector<128xf32> to vector<1x128xf32>
    %15 = vector.shape_cast %14 : vector<1x128xf32> to vector<1x1x128xf32>
    %c0_17 = arith.constant 0 : index
    %c0_18 = arith.constant 0 : index
    %c0_19 = arith.constant 0 : index
    %16 = vector.load %arg8[%c0_17, %c0_18, %c0_19] : memref<1x1x128xf32, #tpu.memory_space<vmem>>, vector<1x1x128xf32>
    tpu.vector_store %arg8[%c0_17, %c0_18, %c0_19], %15 {strides = array<i32>} : memref<1x1x128xf32, #tpu.memory_space<vmem>>, vector<1x1x128xf32>,
    %cst_20 = arith.constant dense<0.000000e+00> : vector<128xf32>
    %17 = vector.multi_reduction <add>, %5, %cst_20 [0] : vector<128x128xf32> to vector<128xf32>
    %18 = vector.shape_cast %17 : vector<128xf32> to vector<1x128xf32>
    %19 = vector.shape_cast %18 : vector<1x128xf32> to vector<1x1x128xf32>
    %c0_21 = arith.constant 0 : index
    %c0_22 = arith.constant 0 : index
    %c0_23 = arith.constant 0 : index
    %20 = vector.load %arg9[%c0_21, %c0_22, %c0_23] : memref<1x1x128xf32, #tpu.memory_space<vmem>>, vector<1x1x128xf32>
    tpu.vector_store %arg9[%c0_21, %c0_22, %c0_23], %19 {strides = array<i32>} : memref<1x1x128xf32, #tpu.memory_space<vmem>>, vector<1x1x128xf32>,
    %21 = arith.mulf %5, %5 : vector<128x128xf32>
    %cst_24 = arith.constant dense<0.000000e+00> : vector<128xf32>
    %22 = vector.multi_reduction <add>, %21, %cst_24 [0] : vector<128x128xf32> to vector<128xf32>
    %23 = vector.shape_cast %22 : vector<128xf32> to vector<1x128xf32>
    %24 = vector.shape_cast %23 : vector<1x128xf32> to vector<1x1x128xf32>
    %c0_25 = arith.constant 0 : index
    %c0_26 = arith.constant 0 : index
    %c0_27 = arith.constant 0 : index
    %25 = vector.load %arg10[%c0_25, %c0_26, %c0_27] : memref<1x1x128xf32, #tpu.memory_space<vmem>>, vector<1x1x128xf32>
    tpu.vector_store %arg10[%c0_25, %c0_26, %c0_27], %24 {strides = array<i32>} : memref<1x1x128xf32, #tpu.memory_space<vmem>>, vector<1x1x128xf32>,
    return
  }
  func.func @transform_0(%arg0: i32) -> (i32, i32) {
    %c0_i32 = arith.constant 0 : i32
    %c0_i32_0 = arith.constant 0 : i32
    return %arg0, %c0_i32 : i32, i32
  }
  func.func @transform_1(%arg0: i32) -> (i32, i32) {
    %c0_i32 = arith.constant 0 : i32
    %c0_i32_0 = arith.constant 0 : i32
    %c0_i32_1 = arith.constant 0 : i32
    return %c0_i32, %c0_i32_0 : i32, i32
  }
  func.func @transform_2(%arg0: i32) -> (i32, i32) {
    %c0_i32 = arith.constant 0 : i32
    %c0_i32_0 = arith.constant 0 : i32
    return %arg0, %c0_i32 : i32, i32
  }
  func.func @transform_3(%arg0: i32) -> (i32, i32) {
    %c0_i32 = arith.constant 0 : i32
    %c0_i32_0 = arith.constant 0 : i32
    %c0_i32_1 = arith.constant 0 : i32
    return %c0_i32, %c0_i32_0 : i32, i32
  }
  func.func @transform_4(%arg0: i32) -> (i32, i32) {
    %c0_i32 = arith.constant 0 : i32
    %c0_i32_0 = arith.constant 0 : i32
    return %arg0, %c0_i32 : i32, i32
  }
  func.func @transform_5(%arg0: i32) -> (i32, i32) {
    %c0_i32 = arith.constant 0 : i32
    %c0_i32_0 = arith.constant 0 : i32
    return %arg0, %c0_i32 : i32, i32
  }
  func.func @transform_6(%arg0: i32) -> (i32, i32, i32) {
    %c0_i32 = arith.constant 0 : i32
    %c0_i32_0 = arith.constant 0 : i32
    %c0_i32_1 = arith.constant 0 : i32
    return %arg0, %c0_i32, %c0_i32_0 : i32, i32, i32
  }
  func.func @transform_7(%arg0: i32) -> (i32, i32, i32) {
    %c0_i32 = arith.constant 0 : i32
    %c0_i32_0 = arith.constant 0 : i32
    %c0_i32_1 = arith.constant 0 : i32
    return %arg0, %c0_i32, %c0_i32_0 : i32, i32, i32
  }
  func.func @transform_8(%arg0: i32) -> (i32, i32, i32) {
    %c0_i32 = arith.constant 0 : i32
    %c0_i32_0 = arith.constant 0 : i32
    %c0_i32_1 = arith.constant 0 : i32
    return %arg0, %c0_i32, %c0_i32_0 : i32, i32, i32
  }
  func.func @transform_9(%arg0: i32) -> (i32, i32, i32) {
    %c0_i32 = arith.constant 0 : i32
    %c0_i32_0 = arith.constant 0 : i32
    %c0_i32_1 = arith.constant 0 : i32
    return %arg0, %c0_i32, %c0_i32_0 : i32, i32, i32
  }
}

module attributes {stable_mosaic.version = 11 : i64} {
  func.func @_apply_res_kernel(%arg0: i32, %arg1: memref<128x128xf32, #tpu.memory_space<vmem>>, %arg2: memref<1x128xf32, #tpu.memory_space<vmem>>, %arg3: memref<1x128xf32, #tpu.memory_space<vmem>>, %arg4: memref<128x128xf32, #tpu.memory_space<vmem>>, %arg5: memref<1x128xf32, #tpu.memory_space<vmem>>, %arg6: memref<1x128xf32, #tpu.memory_space<vmem>>, %arg7: memref<128x128xf32, #tpu.memory_space<vmem>>) attributes {dimension_semantics = [#tpu.dimension_semantics<parallel>], iteration_bounds = array<i64: 1>, scalar_prefetch = 0 : i64, scratch_operands = 0 : i64, tpu.core_type = #tpu.core_type<tc>, window_params = [{transform_indices = @transform_0, window_bounds = array<i64: 128, 128>}, {pipeline_mode = #tpu.pipeline_mode<synchronous>, transform_indices = @transform_1, window_bounds = array<i64: 1, 128>}, {pipeline_mode = #tpu.pipeline_mode<synchronous>, transform_indices = @transform_2, window_bounds = array<i64: 1, 128>}, {transform_indices = @transform_3, window_bounds = array<i64: 128, 128>}, {pipeline_mode = #tpu.pipeline_mode<synchronous>, transform_indices = @transform_4, window_bounds = array<i64: 1, 128>}, {pipeline_mode = #tpu.pipeline_mode<synchronous>, transform_indices = @transform_5, window_bounds = array<i64: 1, 128>}, {transform_indices = @transform_6, window_bounds = array<i64: 128, 128>}]} {
    %c0 = arith.constant 0 : index
    %c0_0 = arith.constant 0 : index
    %0 = vector.load %arg1[%c0, %c0_0] : memref<128x128xf32, #tpu.memory_space<vmem>>, vector<128x128xf32>
    %c0_1 = arith.constant 0 : index
    %c0_2 = arith.constant 0 : index
    %1 = vector.load %arg2[%c0_1, %c0_2] : memref<1x128xf32, #tpu.memory_space<vmem>>, vector<1x128xf32>
    %2 = vector.broadcast %1 : vector<1x128xf32> to vector<128x128xf32>
    %3 = arith.mulf %0, %2 : vector<128x128xf32>
    %c0_3 = arith.constant 0 : index
    %c0_4 = arith.constant 0 : index
    %4 = vector.load %arg3[%c0_3, %c0_4] : memref<1x128xf32, #tpu.memory_space<vmem>>, vector<1x128xf32>
    %5 = vector.broadcast %4 : vector<1x128xf32> to vector<128x128xf32>
    %6 = arith.addf %3, %5 : vector<128x128xf32>
    %c0_5 = arith.constant 0 : index
    %c0_6 = arith.constant 0 : index
    %7 = vector.load %arg4[%c0_5, %c0_6] : memref<128x128xf32, #tpu.memory_space<vmem>>, vector<128x128xf32>
    %c0_7 = arith.constant 0 : index
    %c0_8 = arith.constant 0 : index
    %8 = vector.load %arg5[%c0_7, %c0_8] : memref<1x128xf32, #tpu.memory_space<vmem>>, vector<1x128xf32>
    %9 = vector.broadcast %8 : vector<1x128xf32> to vector<128x128xf32>
    %10 = arith.mulf %7, %9 : vector<128x128xf32>
    %11 = arith.addf %6, %10 : vector<128x128xf32>
    %c0_9 = arith.constant 0 : index
    %c0_10 = arith.constant 0 : index
    %12 = vector.load %arg6[%c0_9, %c0_10] : memref<1x128xf32, #tpu.memory_space<vmem>>, vector<1x128xf32>
    %13 = vector.broadcast %12 : vector<1x128xf32> to vector<128x128xf32>
    %14 = arith.addf %11, %13 : vector<128x128xf32>
    %cst = arith.constant 0.000000e+00 : f32
    %15 = vector.broadcast %cst : f32 to vector<128x128xf32>
    %16 = arith.maximumf %14, %15 : vector<128x128xf32>
    %c0_11 = arith.constant 0 : index
    %c0_12 = arith.constant 0 : index
    %17 = vector.load %arg7[%c0_11, %c0_12] : memref<128x128xf32, #tpu.memory_space<vmem>>, vector<128x128xf32>
    tpu.vector_store %arg7[%c0_11, %c0_12], %16 {strides = array<i32>} : memref<128x128xf32, #tpu.memory_space<vmem>>, vector<128x128xf32>,
    return
  }
  func.func @transform_0(%arg0: i32) -> (i32, i32) {
    %c0_i32 = arith.constant 0 : i32
    %c0_i32_0 = arith.constant 0 : i32
    return %arg0, %c0_i32 : i32, i32
  }
  func.func @transform_1(%arg0: i32) -> (i32, i32) {
    %c0_i32 = arith.constant 0 : i32
    %c0_i32_0 = arith.constant 0 : i32
    %c0_i32_1 = arith.constant 0 : i32
    return %c0_i32, %c0_i32_0 : i32, i32
  }
  func.func @transform_2(%arg0: i32) -> (i32, i32) {
    %c0_i32 = arith.constant 0 : i32
    %c0_i32_0 = arith.constant 0 : i32
    %c0_i32_1 = arith.constant 0 : i32
    return %c0_i32, %c0_i32_0 : i32, i32
  }
  func.func @transform_3(%arg0: i32) -> (i32, i32) {
    %c0_i32 = arith.constant 0 : i32
    %c0_i32_0 = arith.constant 0 : i32
    return %arg0, %c0_i32 : i32, i32
  }
  func.func @transform_4(%arg0: i32) -> (i32, i32) {
    %c0_i32 = arith.constant 0 : i32
    %c0_i32_0 = arith.constant 0 : i32
    %c0_i32_1 = arith.constant 0 : i32
    return %c0_i32, %c0_i32_0 : i32, i32
  }
  func.func @transform_5(%arg0: i32) -> (i32, i32) {
    %c0_i32 = arith.constant 0 : i32
    %c0_i32_0 = arith.constant 0 : i32
    %c0_i32_1 = arith.constant 0 : i32
    return %c0_i32, %c0_i32_0 : i32, i32
  }
  func.func @transform_6(%arg0: i32) -> (i32, i32) {
    %c0_i32 = arith.constant 0 : i32
    %c0_i32_0 = arith.constant 0 : i32
    return %arg0, %c0_i32 : i32, i32
  }
}

module attributes {stable_mosaic.version = 11 : i64} {
  func.func @_gemm_stats_kernel(%arg0: i32, %arg1: memref<128x72xbf16, #tpu.memory_space<vmem>>, %arg2: memref<72x128xbf16, #tpu.memory_space<vmem>>, %arg3: memref<128x128xf32, #tpu.memory_space<vmem>>, %arg4: memref<1x1x128xf32, #tpu.memory_space<vmem>>, %arg5: memref<1x1x128xf32, #tpu.memory_space<vmem>>) attributes {dimension_semantics = [#tpu.dimension_semantics<parallel>], iteration_bounds = array<i64: 1>, scalar_prefetch = 0 : i64, scratch_operands = 0 : i64, tpu.core_type = #tpu.core_type<tc>, window_params = [{transform_indices = @transform_0, window_bounds = array<i64: 128, 72>}, {pipeline_mode = #tpu.pipeline_mode<synchronous>, transform_indices = @transform_1, window_bounds = array<i64: 72, 128>}, {transform_indices = @transform_2, window_bounds = array<i64: 128, 128>}, {transform_indices = @transform_3, window_bounds = array<i64: 1, 1, 128>}, {transform_indices = @transform_4, window_bounds = array<i64: 1, 1, 128>}]} {
    %c0 = arith.constant 0 : index
    %c0_0 = arith.constant 0 : index
    %0 = vector.load %arg1[%c0, %c0_0] : memref<128x72xbf16, #tpu.memory_space<vmem>>, vector<128x72xbf16>
    %c0_1 = arith.constant 0 : index
    %c0_2 = arith.constant 0 : index
    %1 = vector.load %arg2[%c0_1, %c0_2] : memref<72x128xbf16, #tpu.memory_space<vmem>>, vector<72x128xbf16>
    %cst = arith.constant dense<0.000000e+00> : vector<128x128xf32>
    %2 = tpu.matmul %0, %1, %cst {dimension_numbers = #tpu.dot_dimension_numbers<[1], [0], [0], [1], [0, 0, 1, 1], [], []>} : vector<128x72xbf16>, vector<72x128xbf16>, vector<128x128xf32> -> vector<128x128xf32>
    %c0_3 = arith.constant 0 : index
    %c0_4 = arith.constant 0 : index
    %3 = vector.load %arg3[%c0_3, %c0_4] : memref<128x128xf32, #tpu.memory_space<vmem>>, vector<128x128xf32>
    tpu.vector_store %arg3[%c0_3, %c0_4], %2 {strides = array<i32>} : memref<128x128xf32, #tpu.memory_space<vmem>>, vector<128x128xf32>,
    %cst_5 = arith.constant dense<0.000000e+00> : vector<128xf32>
    %4 = vector.multi_reduction <add>, %2, %cst_5 [0] : vector<128x128xf32> to vector<128xf32>
    %5 = vector.shape_cast %4 : vector<128xf32> to vector<1x128xf32>
    %6 = vector.shape_cast %5 : vector<1x128xf32> to vector<1x1x128xf32>
    %c0_6 = arith.constant 0 : index
    %c0_7 = arith.constant 0 : index
    %c0_8 = arith.constant 0 : index
    %7 = vector.load %arg4[%c0_6, %c0_7, %c0_8] : memref<1x1x128xf32, #tpu.memory_space<vmem>>, vector<1x1x128xf32>
    tpu.vector_store %arg4[%c0_6, %c0_7, %c0_8], %6 {strides = array<i32>} : memref<1x1x128xf32, #tpu.memory_space<vmem>>, vector<1x1x128xf32>,
    %8 = arith.mulf %2, %2 : vector<128x128xf32>
    %cst_9 = arith.constant dense<0.000000e+00> : vector<128xf32>
    %9 = vector.multi_reduction <add>, %8, %cst_9 [0] : vector<128x128xf32> to vector<128xf32>
    %10 = vector.shape_cast %9 : vector<128xf32> to vector<1x128xf32>
    %11 = vector.shape_cast %10 : vector<1x128xf32> to vector<1x1x128xf32>
    %c0_10 = arith.constant 0 : index
    %c0_11 = arith.constant 0 : index
    %c0_12 = arith.constant 0 : index
    %12 = vector.load %arg5[%c0_10, %c0_11, %c0_12] : memref<1x1x128xf32, #tpu.memory_space<vmem>>, vector<1x1x128xf32>
    tpu.vector_store %arg5[%c0_10, %c0_11, %c0_12], %11 {strides = array<i32>} : memref<1x1x128xf32, #tpu.memory_space<vmem>>, vector<1x1x128xf32>,
    return
  }
  func.func @transform_0(%arg0: i32) -> (i32, i32) {
    %c0_i32 = arith.constant 0 : i32
    %c0_i32_0 = arith.constant 0 : i32
    return %arg0, %c0_i32 : i32, i32
  }
  func.func @transform_1(%arg0: i32) -> (i32, i32) {
    %c0_i32 = arith.constant 0 : i32
    %c0_i32_0 = arith.constant 0 : i32
    %c0_i32_1 = arith.constant 0 : i32
    return %c0_i32, %c0_i32_0 : i32, i32
  }
  func.func @transform_2(%arg0: i32) -> (i32, i32) {
    %c0_i32 = arith.constant 0 : i32
    %c0_i32_0 = arith.constant 0 : i32
    return %arg0, %c0_i32 : i32, i32
  }
  func.func @transform_3(%arg0: i32) -> (i32, i32, i32) {
    %c0_i32 = arith.constant 0 : i32
    %c0_i32_0 = arith.constant 0 : i32
    %c0_i32_1 = arith.constant 0 : i32
    return %arg0, %c0_i32, %c0_i32_0 : i32, i32, i32
  }
  func.func @transform_4(%arg0: i32) -> (i32, i32, i32) {
    %c0_i32 = arith.constant 0 : i32
    %c0_i32_0 = arith.constant 0 : i32
    %c0_i32_1 = arith.constant 0 : i32
    return %arg0, %c0_i32, %c0_i32_0 : i32, i32, i32
  }
}

</mosaic_0001>

<bundles_post_ra>
// kernel: encoder_forward.9
= control target key start
LH: loop header
LB: loop body
LE: loop exit
PB: predicated region body
PF: predicated region fallthrough
CT: control target
= control target key end

     0   :  { %s254_s0 = inlined_call_operand.vmem [shape: f32[128,128], index: 0, kind: input, shape index: {}, may-alias: {0,3}]   ;;  %s255_s1 = inlined_call_operand.vmem [shape: f32[1,128], index: 1, kind: input, shape index: {}]   ;;  %s256_s2 = inlined_call_operand.vmem [shape: f32[1,128], index: 2, kind: input, shape index: {}]   ;;  %s257_s3 = inlined_call_operand.vmem [shape: f32[128,128], index: 3, kind: output, shape index: {}, may-alias: {0,3}]  }
   0x1   :  { %v14_v0 = vld [vmem:[%s254_s0] sm:$0xff]  ;;  %v15_v4 = vld [vmem:[%s254_s0 + $0x8] sm:$0xff]  ;;  %v16_v5 = vld [vmem:[%s254_s0 + $0x10] sm:$0xff] }
   0x2   :  { %v112_v1 = vld [vmem:[%s255_s1] ss:$0 sm:$0xff]  ;;  %v17_v6 = vld [vmem:[%s254_s0 + $0x18] sm:$0xff]  ;;  %v19_v11 = vld [vmem:[%s254_s0 + $0x28] sm:$0xff] }
   0x3   :  { %v143_v2 = vld [vmem:[%s256_s2] ss:$0 sm:$0xff]  ;;  %v37_v3 = vmul.f32 %v112_v1, %v14_v0  ;;  %v38_v7 = vmul.f32 %v112_v1, %v15_v4  ;;  %v39_v8 = vmul.f32 %v112_v1, %v16_v5  ;;  %v40_v9 = vmul.f32 %v112_v1, %v17_v6  ;;  %v20_v12 = vld [vmem:[%s254_s0 + $0x30] sm:$0xff]  ;;  %v21_v17 = vld [vmem:[%s254_s0 + $0x38] sm:$0xff] }
   0x4   :  { %v18_v10 = vld [vmem:[%s254_s0 + $0x20] sm:$0xff]  ;;  %v42_v15 = vmul.f32 %v112_v1, %v19_v11  ;;  %v43_v16 = vmul.f32 %v112_v1, %v20_v12  ;;  %v44_v21 = vmul.f32 %v112_v1, %v21_v17  ;;  %v23_v27 = vld [vmem:[%s254_s0 + $0x48] sm:$0xff]  ;;  %v24_v28 = vld [vmem:[%s254_s0 + $0x50] sm:$0xff] }
   0x5   :  { %v60_v13 = vadd.f32 %v143_v2, %v37_v3  ;;  %v41_v14 = vmul.f32 %v112_v1, %v18_v10  ;;  %v61_v18 = vadd.f32 %v143_v2, %v38_v7  ;;  %v62_v19 = vadd.f32 %v143_v2, %v39_v8  ;;  %v22_v22 = vld [vmem:[%s254_s0 + $0x40] sm:$0xff]  ;;  %v25_v29 = vld [vmem:[%s254_s0 + $0x58] sm:$0xff]  ;;  %v27_v35 = vld [vmem:[%s254_s0 + $0x68] sm:$0xff] }
   0x6   :  { %v63_v20 = vadd.f32 %v143_v2, %v40_v9  ;;  %v65_v25 = vadd.f32 %v143_v2, %v42_v15  ;;  %v66_v26 = vadd.f32 %v143_v2, %v43_v16  ;;  %v67_v33 = vadd.f32 %v143_v2, %v44_v21  ;;  %v26_v34 = vld [vmem:[%s254_s0 + $0x60] sm:$0xff]  ;;  %v28_v36 = vld [vmem:[%s254_s0 + $0x70] sm:$0xff] }
   0x7   :  { %v76_v23 = vmax.f32 %v60_v13, 0.0  ;;  %v64_v24 = vadd.f32 %v143_v2, %v41_v14  ;;  %v77_v30 = vmax.f32 %v61_v18, 0.0  ;;  %v78_v31 = vmax.f32 %v62_v19, 0.0 }
   0x8   :  { %v79_v32 = vmax.f32 %v63_v20, 0.0  ;;  %v81_v38 = vmax.f32 %v65_v25, 0.0  ;;  %v82_v39 = vmax.f32 %v66_v26, 0.0  ;;  %v45_v40 = vmul.f32 %v112_v1, %v22_v22 }
   0x9   :  { %92 = vst [vmem:[%s257_s3] sm:$0xff] %v76_v23  ;;  %v80_v37 = vmax.f32 %v64_v24, 0.0  ;;  %v83_v42 = vmax.f32 %v67_v33, 0.0  ;;  %v46_v43 = vmul.f32 %v112_v1, %v23_v27  ;;  %v47_v44 = vmul.f32 %v112_v1, %v24_v28 }
   0xa   :  { %v48_v45 = vmul.f32 %v112_v1, %v25_v29  ;;  %v68_v46 = vadd.f32 %v143_v2, %v45_v40  ;;  %v49_v47 = vmul.f32 %v112_v1, %v26_v34  ;;  %v50_v48 = vmul.f32 %v112_v1, %v27_v35 }
   0xb   :  { %v51_v49 = vmul.f32 %v112_v1, %v28_v36  ;;  %v69_v50 = vadd.f32 %v143_v2, %v46_v43  ;;  %v70_v51 = vadd.f32 %v143_v2, %v47_v44 }
   0xc   :  { %v71_v52 = vadd.f32 %v143_v2, %v48_v45  ;;  %v84_v54 = vmax.f32 %v68_v46, 0.0  ;;  %v72_v55 = vadd.f32 %v143_v2, %v49_v47  ;;  %v73_v56 = vadd.f32 %v143_v2, %v50_v48 }
   0xd   :  { %v74_v57 = vadd.f32 %v143_v2, %v51_v49  ;;  %v85_v58 = vmax.f32 %v69_v50, 0.0  ;;  %v86_v59 = vmax.f32 %v70_v51, 0.0 }
   0xe   :  { %v87_v60 = vmax.f32 %v71_v52, 0.0  ;;  %v88_v62 = vmax.f32 %v72_v55, 0.0  ;;  %v89_v63 = vmax.f32 %v73_v56, 0.0 }
   0xf   :  { %v90_v0 = vmax.f32 %v74_v57, 0.0 }
  0x10   :  { %v29_v41 = vld [vmem:[%s254_s0 + $0x78] sm:$0xff] }
  0x11   :  { %93 = vst [vmem:[%s257_s3 + $0x8] sm:$0xff] %v77_v30  ;;  %94 = vst [vmem:[%s257_s3 + $0x10] sm:$0xff] %v78_v31  ;;  %v52_v53 = vmul.f32 %v112_v1, %v29_v41 }
  0x12   :  { %95 = vst [vmem:[%s257_s3 + $0x18] sm:$0xff] %v79_v32  ;;  %96 = vst [vmem:[%s257_s3 + $0x20] sm:$0xff] %v80_v37 }
  0x13   :  { %97 = vst [vmem:[%s257_s3 + $0x28] sm:$0xff] %v81_v38  ;;  %98 = vst [vmem:[%s257_s3 + $0x30] sm:$0xff] %v82_v39  ;;  %v75_v61 = vadd.f32 %v143_v2, %v52_v53 }
  0x14   :  { %99 = vst [vmem:[%s257_s3 + $0x38] sm:$0xff] %v83_v42  ;;  %100 = vst [vmem:[%s257_s3 + $0x40] sm:$0xff] %v84_v54 }
  0x15   :  { %101 = vst [vmem:[%s257_s3 + $0x48] sm:$0xff] %v85_v58  ;;  %102 = vst [vmem:[%s257_s3 + $0x50] sm:$0xff] %v86_v59  ;;  %v91_v1 = vmax.f32 %v75_v61, 0.0 }
  0x16   :  { %103 = vst [vmem:[%s257_s3 + $0x58] sm:$0xff] %v87_v60  ;;  %104 = vst [vmem:[%s257_s3 + $0x60] sm:$0xff] %v88_v62 }
  0x17   :  { %105 = vst [vmem:[%s257_s3 + $0x68] sm:$0xff] %v89_v63  ;;  %106 = vst [vmem:[%s257_s3 + $0x70] sm:$0xff] %v90_v0 }
  0x18   :  { %107 = vst [vmem:[%s257_s3 + $0x78] sm:$0xff] %v91_v1 }

// kernel: encoder_forward.8
= control target key start
LH: loop header
LB: loop body
LE: loop exit
PB: predicated region body
PF: predicated region fallthrough
CT: control target
= control target key end

     0   :  { %vm116_vm0 = vcmask 1043456   ;;  %vm91_vm1 = vcmask 326656   ;;  %s496_s1 = inlined_call_operand.vmem [shape: bf16[40,128], index: 1, kind: input, shape index: {}]   ;;  %s497_s0 = inlined_call_operand.vmem [shape: bf16[128,40], index: 0, kind: input, shape index: {}]   ;;  %s498_s2 = inlined_call_operand.vmem [shape: f32[128,128], index: 2, kind: output, shape index: {0}]   ;;  %s499_s3 = inlined_call_operand.vmem [shape: f32[1,1,128], index: 3, kind: output, shape index: {1}]   ;;  %s500_s4 = inlined_call_operand.vmem [shape: f32[1,1,128], index: 4, kind: output, shape index: {2}]  }
   0x1   :  { %v365_v0 = vld [vmem:[%s496_s1 + $0x10] ss:$0 sps:$4 sm:$0xff]   ;;  %v366_v1 = vld [vmem:[%s496_s1 + $0x8] sm:$0xff]   ;;  %v368_v3 = vld [vmem:[%s497_s0] sm:$0xff]  }
   0x2   :  { %363 = vmatprep.subr.msk.bf16.mxu0 %vm116_vm0, %v365_v0  ;;  %v118_v2 = vsel %vm116_vm0, %v365_v0, 0  ;;  %364 = vmatprep.subr.msk.bf16.mxu1 %vm116_vm0, %v365_v0  ;;  %v367_v4 = vld [vmem:[%s496_s1] sm:$0xff]   ;;  %v369_v6 = vld [vmem:[%s497_s0 + $0x8] sm:$0xff]   ;;  %v370_v8 = vld [vmem:[%s497_s0 + $0x10] sm:$0xff]  }
   0x3   :  { %336 = vmatpush3.bf16.msra.mxu0 %v118_v2  ;;  %360 = vmatpush3.bf16.msra.mxu1 %v118_v2  ;;  %v372_v5 = vld [vmem:[%s497_s0 + $0x20] sm:$0xff]   ;;  %v373_v7 = vld [vmem:[%s497_s0 + $0x28] sm:$0xff]   ;;  %v374_v9 = vld [vmem:[%s497_s0 + $0x30] sm:$0xff]  }
   0x4   :  { %337 = vmatprep.subr.bf16.mxu0 %v366_v1  ;;  %358 = vmatprep.subr.bf16.mxu1 %v366_v1  ;;  %v371_v10 = vld [vmem:[%s497_s0 + $0x18] sm:$0xff]  }
   0x5   :  { %341 = vmatprep.mubr.msk.bf16.mxu0 %vm91_vm1, %v368_v3  ;;  %349 = vmatprep.mubr.msk.bf16.mxu1 %vm91_vm1, %v372_v5  ;;  %v375_v11 = vld [vmem:[%s497_s0 + $0x38] sm:$0xff]  }
   0x7   :  { %338 = vmatpush3.bf16.msra.mxu0 %v366_v1  ;;  %361 = vmatpush3.bf16.msra.mxu1 %v366_v1 }
   0x8   :  { %339 = vmatprep.subr.bf16.mxu0 %v367_v4  ;;  %359 = vmatprep.subr.bf16.mxu1 %v367_v4 }
   0xb   :  { %340 = vmatpush3.bf16.msra.mxu0 %v367_v4  ;;  %362 = vmatpush3.bf16.msra.mxu1 %v367_v4 }
   0xe   :  { %342 = vmatmul.mubr.msk.bf16.vlgmr.msra.gmra.mxu0 %vm91_vm1, %v369_v6  ;;  %350 = vmatmul.mubr.msk.bf16.vlgmr.msra.gmra.mxu1 %vm91_vm1, %v373_v7 }
   0xf   :  { %345 = vmatprep.mubr.msk.bf16.mxu0 %vm91_vm1, %v370_v8  ;;  %353 = vmatprep.mubr.msk.bf16.mxu1 %vm91_vm1, %v374_v9 }
  0x16   :  { %346 = vmatmul.mubr.msk.bf16.gmra.mxu0 %vm91_vm1, %v371_v10  ;;  %354 = vmatmul.mubr.msk.bf16.gmra.mxu1 %vm91_vm1, %v375_v11 }
  0xce   :  { %v343_v12 = vpop.f32.mrf.mxu0  ;;  %v351_v13 = vpop.f32.mrf.mxu1 }
  0xcf   :  { %219 = vst [vmem:[%s498_s2 + $0x10] sm:$0xff] %v343_v12  ;;  %227 = vst [vmem:[%s498_s2 + $0x50] sm:$0xff] %v351_v13  ;;  %v257_v25 = vmul.f32 %v343_v12, %v343_v12  ;;  %v265_v55 = vmul.f32 %v351_v13, %v351_v13 }
  0xd0   :  { %v154_v14 = vpop.f32.mrf.mxu0  ;;  %v186_v15 = vpop.f32.mrf.mxu1 }
  0xd1   :  { %217 = vst [vmem:[%s498_s2] sm:$0xff] %v154_v14  ;;  %225 = vst [vmem:[%s498_s2 + $0x40] sm:$0xff] %v186_v15  ;;  %v255_v20 = vmul.f32 %v154_v14, %v154_v14  ;;  %v263_v49 = vmul.f32 %v186_v15, %v186_v15 }
  0xd2   :  { %v344_v16 = vpop.f32.mrf.mxu0  ;;  %v352_v17 = vpop.f32.mrf.mxu1 }
  0xd3   :  { %220 = vst [vmem:[%s498_s2 + $0x18] sm:$0xff] %v344_v16  ;;  %228 = vst [vmem:[%s498_s2 + $0x58] sm:$0xff] %v352_v17  ;;  %v258_v30 = vmul.f32 %v344_v16, %v344_v16  ;;  %v266_v58 = vmul.f32 %v352_v17, %v352_v17 }
  0xd4   :  { %v157_v18 = vpop.f32.mrf.mxu0  ;;  %v189_v19 = vpop.f32.mrf.mxu1 }
  0xd5   :  { %218 = vst [vmem:[%s498_s2 + $0x8] sm:$0xff] %v157_v18  ;;  %v233_v21 = vadd.f32 %v157_v18, %v154_v14  ;;  %v256_v22 = vmul.f32 %v157_v18, %v157_v18  ;;  %226 = vst [vmem:[%s498_s2 + $0x48] sm:$0xff] %v189_v19  ;;  %v264_v53 = vmul.f32 %v189_v19, %v189_v19 }
  0xd6   :  { %v347_v23 = vpop.f32.mrf.mxu0  ;;  %v355_v24 = vpop.f32.mrf.mxu1 }
  0xd7   :  { %v234_v26 = vadd.f32 %v343_v12, %v233_v21  ;;  %v271_v27 = vadd.f32 %v256_v22, %v255_v20  ;;  %223 = vst [vmem:[%s498_s2 + $0x30] sm:$0xff] %v347_v23  ;;  %231 = vst [vmem:[%s498_s2 + $0x70] sm:$0xff] %v355_v24  ;;  %v261_v43 = vmul.f32 %v347_v23, %v347_v23 }
  0xd8   :  { %v170_v28 = vpop.f32.mrf.mxu0  ;;  %v202_v29 = vpop.f32.mrf.mxu1  ;;  %v269_v3 = vmul.f32 %v355_v24, %v355_v24 }
  0xd9   :  { %v272_v31 = vadd.f32 %v271_v27, %v257_v25  ;;  %221 = vst [vmem:[%s498_s2 + $0x20] sm:$0xff] %v170_v28  ;;  %v235_v32 = vadd.f32 %v344_v16, %v234_v26  ;;  %229 = vst [vmem:[%s498_s2 + $0x60] sm:$0xff] %v202_v29  ;;  %v259_v36 = vmul.f32 %v170_v28, %v170_v28 }
  0xda   :  { %v348_v33 = vpop.f32.mrf.mxu0  ;;  %v356_v34 = vpop.f32.mrf.mxu1  ;;  %v267_v62 = vmul.f32 %v202_v29, %v202_v29 }
  0xdb   :  { %v236_v35 = vadd.f32 %v235_v32, %v170_v28  ;;  %v273_v37 = vadd.f32 %v272_v31, %v258_v30  ;;  %224 = vst [vmem:[%s498_s2 + $0x38] sm:$0xff] %v348_v33  ;;  %232 = vst [vmem:[%s498_s2 + $0x78] sm:$0xff] %v356_v34  ;;  %v262_v46 = vmul.f32 %v348_v33, %v348_v33 }
  0xdc   :  { %v173_v38 = vpop.f32.mrf.mxu0  ;;  %v205_v39 = vpop.f32.mrf.mxu1  ;;  %v270_v6 = vmul.f32 %v356_v34, %v356_v34 }
  0xdd   :  { %v274_v40 = vadd.f32 %v273_v37, %v259_v36  ;;  %222 = vst [vmem:[%s498_s2 + $0x28] sm:$0xff] %v173_v38  ;;  %v237_v41 = vadd.f32 %v236_v35, %v173_v38  ;;  %v260_v42 = vmul.f32 %v173_v38, %v173_v38  ;;  %230 = vst [vmem:[%s498_s2 + $0x68] sm:$0xff] %v205_v39 }
  0xde   :  { %v268_v2 = vmul.f32 %v205_v39, %v205_v39 }
  0xdf   :  { %v238_v44 = vadd.f32 %v347_v23, %v237_v41  ;;  %v275_v45 = vadd.f32 %v274_v40, %v260_v42 }
  0xe1   :  { %v239_v47 = vadd.f32 %v348_v33, %v238_v44  ;;  %v276_v48 = vadd.f32 %v275_v45, %v261_v43 }
  0xe3   :  { %v277_v50 = vadd.f32 %v276_v48, %v262_v46  ;;  %v240_v51 = vadd.f32 %v239_v47, %v186_v15 }
  0xe5   :  { %v241_v52 = vadd.f32 %v240_v51, %v189_v19  ;;  %v278_v54 = vadd.f32 %v277_v50, %v263_v49 }
  0xe7   :  { %v242_v56 = vadd.f32 %v351_v13, %v241_v52  ;;  %v279_v57 = vadd.f32 %v278_v54, %v264_v53 }
  0xe9   :  { %v280_v59 = vadd.f32 %v279_v57, %v265_v55  ;;  %v243_v60 = vadd.f32 %v352_v17, %v242_v56 }
  0xeb   :  { %v244_v61 = vadd.f32 %v243_v60, %v202_v29  ;;  %v281_v63 = vadd.f32 %v280_v59, %v266_v58 }
  0xed   :  { %v282_v0 = vadd.f32 %v281_v63, %v267_v62  ;;  %v245_v1 = vadd.f32 %v244_v61, %v205_v39 }
  0xef   :  { %v246_v4 = vadd.f32 %v355_v24, %v245_v1  ;;  %v283_v5 = vadd.f32 %v282_v0, %v268_v2 }
  0xf1   :  { %v247_v7 = vadd.f32 %v356_v34, %v246_v4  ;;  %v284_v8 = vadd.f32 %v283_v5, %v269_v3 }
  0xf3   :  { %v248_v9 = vrot.slane %v247_v7, 4  ;;  %v285_v10 = vadd.f32 %v284_v8, %v270_v6 }
  0xf5   :  { %v249_v11 = vadd.f32 %v248_v9, %v247_v7  ;;  %v286_v12 = vrot.slane %v285_v10, 4 }
  0xf7   :  { %v250_v13 = vrot.slane %v249_v11, 2  ;;  %v287_v14 = vadd.f32 %v286_v12, %v285_v10 }
  0xf9   :  { %v251_v15 = vadd.f32 %v250_v13, %v249_v11  ;;  %v288_v16 = vrot.slane %v287_v14, 2 }
  0xfb   :  { %v252_v17 = vrot.slane %v251_v15, 1  ;;  %v289_v18 = vadd.f32 %v288_v16, %v287_v14 }
  0xfd   :  { %v253_v19 = vadd.f32 %v252_v17, %v251_v15  ;;  %v290_v20 = vrot.slane %v289_v18, 1 }
  0xff   :  { %254 = vst [vmem:[%s499_s3] sm:$0x1] %v253_v19  ;;  %v291_v21 = vadd.f32 %v290_v20, %v289_v18 }
 0x101   :  { %292 = vst [vmem:[%s500_s4] sm:$0x1] %v291_v21 }

// kernel: encoder_forward.11
= control target key start
LH: loop header
LB: loop body
LE: loop exit
PB: predicated region body
PF: predicated region fallthrough
CT: control target
= control target key end

     0   :  { %s466_s0 = inlined_call_operand.vmem [shape: f32[128,128], index: 0, kind: input, shape index: {}, may-alias: {0,6}]   ;;  %s467_s1 = inlined_call_operand.vmem [shape: f32[1,128], index: 1, kind: input, shape index: {}]   ;;  %s468_s2 = inlined_call_operand.vmem [shape: f32[1,128], index: 2, kind: input, shape index: {}]   ;;  %s469_s3 = inlined_call_operand.vmem [shape: f32[128,128], index: 3, kind: input, shape index: {}]   ;;  %s470_s4 = inlined_call_operand.vmem [shape: f32[1,128], index: 4, kind: input, shape index: {}]   ;;  %s471_s5 = inlined_call_operand.vmem [shape: f32[1,128], index: 5, kind: input, shape index: {}]   ;;  %s472_s6 = inlined_call_operand.vmem [shape: f32[128,128], index: 6, kind: output, shape index: {}, may-alias: {0,6}]  }
   0x1   :  { %v23_v0 = vld [vmem:[%s466_s0] sm:$0xff]  ;;  %v24_v8 = vld [vmem:[%s466_s0 + $0x8] sm:$0xff]  ;;  %v25_v10 = vld [vmem:[%s466_s0 + $0x10] sm:$0xff] }
   0x2   :  { %v244_v1 = vld [vmem:[%s467_s1] ss:$0 sm:$0xff]  ;;  %v86_v9 = vld [vmem:[%s469_s3 + $0x8] sm:$0xff]  ;;  %v87_v15 = vld [vmem:[%s469_s3 + $0x10] sm:$0xff] }
   0x3   :  { %v249_v2 = vld [vmem:[%s468_s2] ss:$0 sm:$0xff]  ;;  %v46_v3 = vmul.f32 %v244_v1, %v23_v0  ;;  %v47_v12 = vmul.f32 %v244_v1, %v24_v8  ;;  %v48_v14 = vmul.f32 %v244_v1, %v25_v10  ;;  %v26_v16 = vld [vmem:[%s466_s0 + $0x18] sm:$0xff]  ;;  %v28_v23 = vld [vmem:[%s466_s0 + $0x28] sm:$0xff] }
   0x4   :  { %v85_v4 = vld [vmem:[%s469_s3] sm:$0xff]  ;;  %v88_v17 = vld [vmem:[%s469_s3 + $0x18] sm:$0xff]  ;;  %v49_v19 = vmul.f32 %v244_v1, %v26_v16  ;;  %v90_v28 = vld [vmem:[%s469_s3 + $0x28] sm:$0xff]  ;;  %v51_v33 = vmul.f32 %v244_v1, %v28_v23 }
   0x5   :  { %v258_v5 = vld [vmem:[%s470_s4] ss:$0 sm:$0xff]  ;;  %v69_v11 = vadd.f32 %v249_v2, %v46_v3  ;;  %v70_v25 = vadd.f32 %v249_v2, %v47_v12  ;;  %v71_v26 = vadd.f32 %v249_v2, %v48_v14  ;;  %v29_v29 = vld [vmem:[%s466_s0 + $0x30] sm:$0xff]  ;;  %v30_v39 = vld [vmem:[%s466_s0 + $0x38] sm:$0xff] }
   0x6   :  { %v108_v6 = vmul.f32 %v258_v5, %v85_v4  ;;  %v264_v7 = vld [vmem:[%s471_s5] ss:$0 sm:$0xff]  ;;  %v109_v13 = vmul.f32 %v258_v5, %v86_v9  ;;  %v110_v18 = vmul.f32 %v258_v5, %v87_v15  ;;  %v111_v20 = vmul.f32 %v258_v5, %v88_v17  ;;  %v91_v30 = vld [vmem:[%s469_s3 + $0x30] sm:$0xff]  ;;  %v92_v44 = vld [vmem:[%s469_s3 + $0x38] sm:$0xff] }
   0x7   :  { %v27_v21 = vld [vmem:[%s466_s0 + $0x20] sm:$0xff]  ;;  %v72_v31 = vadd.f32 %v249_v2, %v49_v19  ;;  %v113_v34 = vmul.f32 %v258_v5, %v90_v28  ;;  %v74_v41 = vadd.f32 %v249_v2, %v51_v33  ;;  %v52_v42 = vmul.f32 %v244_v1, %v29_v29  ;;  %v32_v55 = vld [vmem:[%s466_s0 + $0x48] sm:$0xff]  ;;  %v95_v4 = vld [vmem:[%s469_s3 + $0x50] sm:$0xff] }
   0x8   :  { %v89_v22 = vld [vmem:[%s469_s3 + $0x20] sm:$0xff]  ;;  %v124_v24 = vadd.f32 %v108_v6, %v69_v11  ;;  %v50_v27 = vmul.f32 %v244_v1, %v27_v21  ;;  %v125_v36 = vadd.f32 %v109_v13, %v70_v25  ;;  %v126_v37 = vadd.f32 %v110_v18, %v71_v26  ;;  %v94_v60 = vld [vmem:[%s469_s3 + $0x48] sm:$0xff]  ;;  %v96_v12 = vld [vmem:[%s469_s3 + $0x58] sm:$0xff] }
   0x9   :  { %v112_v32 = vmul.f32 %v258_v5, %v89_v22  ;;  %v127_v40 = vadd.f32 %v111_v20, %v72_v31  ;;  %v114_v43 = vmul.f32 %v258_v5, %v91_v30  ;;  %v129_v50 = vadd.f32 %v113_v34, %v74_v41  ;;  %v31_v53 = vld [vmem:[%s466_s0 + $0x40] sm:$0xff] }
   0xa   :  { %v147_v35 = vadd.f32 %v264_v7, %v124_v24  ;;  %v73_v38 = vadd.f32 %v249_v2, %v50_v27  ;;  %v148_v46 = vadd.f32 %v264_v7, %v125_v36  ;;  %v149_v47 = vadd.f32 %v264_v7, %v126_v37  ;;  %v93_v54 = vld [vmem:[%s469_s3 + $0x40] sm:$0xff] }
   0xb   :  { %v150_v49 = vadd.f32 %v264_v7, %v127_v40  ;;  %v75_v51 = vadd.f32 %v249_v2, %v52_v42  ;;  %v53_v52 = vmul.f32 %v244_v1, %v30_v39  ;;  %v115_v59 = vmul.f32 %v258_v5, %v92_v44  ;;  %v97_v22 = vld [vmem:[%s469_s3 + $0x60] sm:$0xff]  ;;  %v99_v42 = vld [vmem:[%s469_s3 + $0x70] sm:$0xff] }
   0xc   :  { %v163_v45 = vmax.f32 %v147_v35, 0.0  ;;  %v128_v48 = vadd.f32 %v112_v32, %v73_v38  ;;  %v164_v56 = vmax.f32 %v148_v46, 0.0  ;;  %v165_v57 = vmax.f32 %v149_v47, 0.0  ;;  %v98_v32 = vld [vmem:[%s469_s3 + $0x68] sm:$0xff] }
   0xd   :  { %v166_v61 = vmax.f32 %v150_v49, 0.0  ;;  %v152_v62 = vadd.f32 %v264_v7, %v129_v50  ;;  %v130_v63 = vadd.f32 %v114_v43, %v75_v51  ;;  %v76_v0 = vadd.f32 %v249_v2, %v53_v52 }
   0xe   :  { %179 = vst [vmem:[%s472_s6] sm:$0xff] %v163_v45  ;;  %v151_v58 = vadd.f32 %v264_v7, %v128_v48  ;;  %v54_v8 = vmul.f32 %v244_v1, %v31_v53  ;;  %v116_v9 = vmul.f32 %v258_v5, %v93_v54  ;;  %v55_v10 = vmul.f32 %v244_v1, %v32_v55  ;;  %v100_v48 = vld [vmem:[%s469_s3 + $0x78] sm:$0xff] }
   0xf   :  { %v168_v13 = vmax.f32 %v152_v62, 0.0  ;;  %v153_v14 = vadd.f32 %v264_v7, %v130_v63  ;;  %v131_v15 = vadd.f32 %v115_v59, %v76_v0  ;;  %v117_v16 = vmul.f32 %v258_v5, %v94_v60 }
  0x10   :  { %v167_v6 = vmax.f32 %v151_v58, 0.0  ;;  %v77_v18 = vadd.f32 %v249_v2, %v54_v8  ;;  %v78_v19 = vadd.f32 %v249_v2, %v55_v10  ;;  %v118_v21 = vmul.f32 %v258_v5, %v95_v4 }
  0x11   :  { %v169_v24 = vmax.f32 %v153_v14, 0.0  ;;  %v154_v25 = vadd.f32 %v264_v7, %v131_v15  ;;  %v119_v27 = vmul.f32 %v258_v5, %v96_v12  ;;  %v120_v36 = vmul.f32 %v258_v5, %v97_v22 }
  0x12   :  { %v132_v28 = vadd.f32 %v116_v9, %v77_v18  ;;  %v133_v29 = vadd.f32 %v117_v16, %v78_v19  ;;  %v121_v45 = vmul.f32 %v258_v5, %v98_v32  ;;  %v123_v60 = vmul.f32 %v258_v5, %v100_v48 }
  0x13   :  { %v170_v34 = vmax.f32 %v154_v25, 0.0 }
  0x14   :  { %v155_v38 = vadd.f32 %v264_v7, %v132_v28  ;;  %v156_v39 = vadd.f32 %v264_v7, %v133_v29 }
  0x15   :  { %v33_v3 = vld [vmem:[%s466_s0 + $0x50] sm:$0xff] }
  0x16   :  { %180 = vst [vmem:[%s472_s6 + $0x8] sm:$0xff] %v164_v56  ;;  %181 = vst [vmem:[%s472_s6 + $0x10] sm:$0xff] %v165_v57  ;;  %v56_v20 = vmul.f32 %v244_v1, %v33_v3  ;;  %v171_v49 = vmax.f32 %v155_v38, 0.0  ;;  %v172_v50 = vmax.f32 %v156_v39, 0.0  ;;  %v122_v56 = vmul.f32 %v258_v5, %v99_v42 }
  0x18   :  { %v79_v30 = vadd.f32 %v249_v2, %v56_v20 }
  0x1a   :  { %v134_v40 = vadd.f32 %v118_v21, %v79_v30 }
  0x1c   :  { %v157_v51 = vadd.f32 %v264_v7, %v134_v40 }
  0x1d   :  { %v34_v11 = vld [vmem:[%s466_s0 + $0x58] sm:$0xff] }
  0x1e   :  { %182 = vst [vmem:[%s472_s6 + $0x18] sm:$0xff] %v166_v61  ;;  %v57_v26 = vmul.f32 %v244_v1, %v34_v11  ;;  %v173_v57 = vmax.f32 %v157_v51, 0.0 }
  0x20   :  { %v80_v35 = vadd.f32 %v249_v2, %v57_v26 }
  0x22   :  { %v135_v43 = vadd.f32 %v119_v27, %v80_v35 }
  0x24   :  { %v158_v53 = vadd.f32 %v264_v7, %v135_v43 }
  0x25   :  { %v35_v17 = vld [vmem:[%s466_s0 + $0x60] sm:$0xff] }
  0x26   :  { %183 = vst [vmem:[%s472_s6 + $0x20] sm:$0xff] %v167_v6  ;;  %v58_v31 = vmul.f32 %v244_v1, %v35_v17  ;;  %v174_v61 = vmax.f32 %v158_v53, 0.0 }
  0x28   :  { %v81_v41 = vadd.f32 %v249_v2, %v58_v31 }
  0x2a   :  { %v136_v52 = vadd.f32 %v120_v36, %v81_v41 }
  0x2c   :  { %v159_v58 = vadd.f32 %v264_v7, %v136_v52 }
  0x2d   :  { %v36_v23 = vld [vmem:[%s466_s0 + $0x68] sm:$0xff] }
  0x2e   :  { %184 = vst [vmem:[%s472_s6 + $0x28] sm:$0xff] %v168_v13  ;;  %v59_v37 = vmul.f32 %v244_v1, %v36_v23  ;;  %v175_v0 = vmax.f32 %v159_v58, 0.0 }
  0x30   :  { %v82_v44 = vadd.f32 %v249_v2, %v59_v37 }
  0x32   :  { %v137_v54 = vadd.f32 %v121_v45, %v82_v44 }
  0x34   :  { %v160_v62 = vadd.f32 %v264_v7, %v137_v54 }
  0x35   :  { %v37_v33 = vld [vmem:[%s466_s0 + $0x70] sm:$0xff] }
  0x36   :  { %185 = vst [vmem:[%s472_s6 + $0x30] sm:$0xff] %v169_v24  ;;  %186 = vst [vmem:[%s472_s6 + $0x38] sm:$0xff] %v170_v34  ;;  %v60_v46 = vmul.f32 %v244_v1, %v37_v33  ;;  %v176_v4 = vmax.f32 %v160_v62, 0.0 }
  0x38   :  { %v83_v55 = vadd.f32 %v249_v2, %v60_v46 }
  0x3a   :  { %v138_v63 = vadd.f32 %v122_v56, %v83_v55 }
  0x3d   :  { %v38_v47 = vld [vmem:[%s466_s0 + $0x78] sm:$0xff] }
  0x3e   :  { %187 = vst [vmem:[%s472_s6 + $0x40] sm:$0xff] %v171_v49  ;;  %188 = vst [vmem:[%s472_s6 + $0x48] sm:$0xff] %v172_v50  ;;  %v61_v59 = vmul.f32 %v244_v1, %v38_v47  ;;  %v161_v1 = vadd.f32 %v264_v7, %v138_v63 }
  0x3f   :  { %189 = vst [vmem:[%s472_s6 + $0x50] sm:$0xff] %v173_v57  ;;  %190 = vst [vmem:[%s472_s6 + $0x58] sm:$0xff] %v174_v61 }
  0x40   :  { %v84_v3 = vadd.f32 %v249_v2, %v61_v59  ;;  %191 = vst [vmem:[%s472_s6 + $0x60] sm:$0xff] %v175_v0  ;;  %192 = vst [vmem:[%s472_s6 + $0x68] sm:$0xff] %v176_v4  ;;  %v177_v6 = vmax.f32 %v161_v1, 0.0 }
  0x42   :  { %v139_v5 = vadd.f32 %v123_v60, %v84_v3  ;;  %193 = vst [vmem:[%s472_s6 + $0x70] sm:$0xff] %v177_v6 }
  0x44   :  { %v162_v8 = vadd.f32 %v264_v7, %v139_v5 }
  0x46   :  { %v178_v2 = vmax.f32 %v162_v8, 0.0 }
  0x48   :  { %194 = vst [vmem:[%s472_s6 + $0x78] sm:$0xff] %v178_v2 }

// kernel: encoder_forward.10
= control target key start
LH: loop header
LB: loop body
LE: loop exit
PB: predicated region body
PF: predicated region fallthrough
CT: control target
= control target key end

     0   :  { %vm141_vm0 = vcmask 1043456   ;;  %vm299_vm1 = vcmask 64512   ;;  %vm116_vm2 = vcmask 588800   ;;  %s966_s1 = inlined_call_operand.vmem [shape: bf16[72,128], index: 1, kind: input, shape index: {}]   ;;  %s967_s3 = inlined_call_operand.vmem [shape: bf16[8,128], index: 3, kind: input, shape index: {}]   ;;  %s968_s2 = inlined_call_operand.vmem [shape: bf16[128,8], index: 2, kind: input, shape index: {}]   ;;  %s969_s0 = inlined_call_operand.vmem [shape: bf16[128,72], index: 0, kind: input, shape index: {}]   ;;  %s970_s5 = inlined_call_operand.vmem [shape: f32[128,128], index: 5, kind: output, shape index: {1}]   ;;  %s971_s4 = inlined_call_operand.vmem [shape: f32[128,128], index: 4, kind: output, shape index: {0}]   ;;  %s972_s8 = inlined_call_operand.vmem [shape: f32[1,1,128], index: 8, kind: output, shape index: {4}]   ;;  %s973_s9 = inlined_call_operand.vmem [shape: f32[1,1,128], index: 9, kind: output, shape index: {5}]   ;;  %s974_s6 = inlined_call_operand.vmem [shape: f32[1,1,128], index: 6, kind: output, shape index: {2}]   ;;  %s975_s7 = inlined_call_operand.vmem [shape: f32[1,1,128], index: 7, kind: output, shape index: {3}]  }
   0x1   :  { %v705_v0 = vld [vmem:[%s966_s1 + $0x20] ss:$0 sps:$4 sm:$0xff]   ;;  %v707_v5 = vld [vmem:[%s966_s1 + $0x18] sm:$0xff]   ;;  %v708_v6 = vld [vmem:[%s968_s2 + $0x8] sm:$0xff]  }
   0x2   :  { %v258_v1 = vld [vmem:[%s967_s3] sm:$0xf]  ;;  %703 = vmatprep.subr.msk.bf16.mxu0 %vm141_vm0, %v705_v0  ;;  %v143_v4 = vsel %vm141_vm0, %v705_v0, 0  ;;  %v709_v7 = vld [vmem:[%s966_s1 + $0x10] sm:$0xff]   ;;  %v711_v9 = vld [vmem:[%s966_s1 + $0x8] sm:$0xff]  }
   0x3   :  { %704 = vmatprep.subr.msk.bf16.mxu1 %vm141_vm0, %v258_v1  ;;  %v325_v2 = vsel %vm141_vm0, %v258_v1, 0  ;;  %v706_v3 = vld [vmem:[%s968_s2] sm:$0xff]   ;;  %660 = vmatpush3.bf16.msra.mxu0 %v143_v4  ;;  %v710_v8 = vld [vmem:[%s968_s2 + $0x10] sm:$0xff]   ;;  %v712_v10 = vld [vmem:[%s968_s2 + $0x18] sm:$0xff]  }
   0x4   :  { %686 = vmatpush3.bf16.msra.mxu1 %v325_v2  ;;  %687 = vmatprep.mubr.msk.bf16.mxu1 %vm299_vm1, %v706_v3  ;;  %v714_v11 = vld [vmem:[%s969_s0] sm:$0xff]   ;;  %v716_v14 = vld [vmem:[%s969_s0 + $0x8] sm:$0xff]   ;;  %v719_v16 = vld [vmem:[%s968_s2 + $0x30] sm:$0xff]  }
   0x5   :  { %661 = vmatprep.subr.bf16.mxu0 %v707_v5  ;;  %v715_v12 = vld [vmem:[%s968_s2 + $0x20] sm:$0xff]   ;;  %669 = vmatprep.mubr.msk.bf16.mxu0 %vm116_vm2, %v714_v11  ;;  %v717_v15 = vld [vmem:[%s968_s2 + $0x28] sm:$0xff]   ;;  %v718_v17 = vld [vmem:[%s969_s0 + $0x10] sm:$0xff]  }
   0x6   :  { %v713_v13 = vld [vmem:[%s966_s1] sm:$0xff]   ;;  %v721_v18 = vld [vmem:[%s968_s2 + $0x38] sm:$0xff]   ;;  %v723_v21 = vld [vmem:[%s969_s0 + $0x28] sm:$0xff]  }
   0x7   :  { %688 = vmatmul.mubr.msk.bf16.vlgmr.msra.gmra.mxu1 %vm299_vm1, %v708_v6  ;;  %662 = vmatpush3.bf16.msra.mxu0 %v707_v5  ;;  %v720_v19 = vld [vmem:[%s969_s0 + $0x18] sm:$0xff]   ;;  %v722_v20 = vld [vmem:[%s969_s0 + $0x20] sm:$0xff]   ;;  %v724_v22 = vld [vmem:[%s969_s0 + $0x30] sm:$0xff]  }
   0x8   :  { %691 = vmatprep.mubr.msk.bf16.mxu1 %vm299_vm1, %v710_v8  ;;  %663 = vmatprep.subr.bf16.mxu0 %v709_v7  ;;  %v725_v23 = vld [vmem:[%s969_s0 + $0x38] sm:$0xff]  }
   0xb   :  { %664 = vmatpush3.bf16.msra.mxu0 %v709_v7 }
   0xc   :  { %665 = vmatprep.subr.bf16.mxu0 %v711_v9 }
   0xf   :  { %692 = vmatmul.mubr.msk.bf16.gmra.mxu1 %vm299_vm1, %v712_v10  ;;  %666 = vmatpush3.bf16.msra.mxu0 %v711_v9 }
  0x10   :  { %695 = vmatprep.mubr.msk.bf16.mxu1 %vm299_vm1, %v715_v12  ;;  %667 = vmatprep.subr.bf16.mxu0 %v713_v13 }
  0x13   :  { %668 = vmatpush3.bf16.msra.mxu0 %v713_v13 }
  0x16   :  { %670 = vmatmul.mubr.msk.bf16.vlgmr.msra.gmra.mxu0 %vm116_vm2, %v716_v14 }
  0x17   :  { %696 = vmatmul.mubr.msk.bf16.gmra.mxu1 %vm299_vm1, %v717_v15  ;;  %673 = vmatprep.mubr.msk.bf16.mxu0 %vm116_vm2, %v718_v17 }
  0x18   :  { %699 = vmatprep.mubr.msk.bf16.mxu1 %vm299_vm1, %v719_v16 }
  0x1e   :  { %674 = vmatmul.mubr.msk.bf16.gmra.mxu0 %vm116_vm2, %v720_v19 }
  0x1f   :  { %700 = vmatmul.mubr.msk.bf16.gmra.mxu1 %vm299_vm1, %v721_v18  ;;  %677 = vmatprep.mubr.msk.bf16.mxu0 %vm116_vm2, %v722_v20 }
  0x26   :  { %678 = vmatmul.mubr.msk.bf16.gmra.mxu0 %vm116_vm2, %v723_v21 }
  0x27   :  { %681 = vmatprep.mubr.msk.bf16.mxu0 %vm116_vm2, %v724_v22 }
  0x2e   :  { %682 = vmatmul.mubr.msk.bf16.gmra.mxu0 %vm116_vm2, %v725_v23 }
  0xc7   :  { %v689_v24 = vpop.f32.mrf.mxu1 }
  0xc8   :  { %442 = vst [vmem:[%s970_s5 + $0x10] sm:$0xff] %v689_v24  ;;  %v540_v29 = vmul.f32 %v689_v24, %v689_v24 }
  0xc9   :  { %v361_v25 = vpop.f32.mrf.mxu1 }
  0xca   :  { %440 = vst [vmem:[%s970_s5] sm:$0xff] %v361_v25  ;;  %v538_v27 = vmul.f32 %v361_v25, %v361_v25 }
  0xcb   :  { %v690_v26 = vpop.f32.mrf.mxu1 }
  0xcc   :  { %443 = vst [vmem:[%s970_s5 + $0x18] sm:$0xff] %v690_v26  ;;  %v541_v33 = vmul.f32 %v690_v26, %v690_v26 }
  0xcd   :  { %v364_v28 = vpop.f32.mrf.mxu1 }
  0xce   :  { %441 = vst [vmem:[%s970_s5 + $0x8] sm:$0xff] %v364_v28  ;;  %v516_v30 = vadd.f32 %v364_v28, %v361_v25  ;;  %v539_v31 = vmul.f32 %v364_v28, %v364_v28 }
  0xcf   :  { %v693_v32 = vpop.f32.mrf.mxu1 }
  0xd0   :  { %v517_v34 = vadd.f32 %v689_v24, %v516_v30  ;;  %v554_v35 = vadd.f32 %v539_v31, %v538_v27  ;;  %446 = vst [vmem:[%s970_s5 + $0x30] sm:$0xff] %v693_v32  ;;  %v544_v44 = vmul.f32 %v693_v32, %v693_v32 }
  0xd1   :  { %v377_v36 = vpop.f32.mrf.mxu1 }
  0xd2   :  { %v555_v37 = vadd.f32 %v554_v35, %v540_v29  ;;  %444 = vst [vmem:[%s970_s5 + $0x20] sm:$0xff] %v377_v36  ;;  %v518_v38 = vadd.f32 %v690_v26, %v517_v34  ;;  %v542_v39 = vmul.f32 %v377_v36, %v377_v36 }
  0xd3   :  { %v694_v40 = vpop.f32.mrf.mxu1 }
  0xd4   :  { %v519_v41 = vadd.f32 %v518_v38, %v377_v36  ;;  %v556_v42 = vadd.f32 %v555_v37, %v541_v33  ;;  %447 = vst [vmem:[%s970_s5 + $0x38] sm:$0xff] %v694_v40  ;;  %v545_v49 = vmul.f32 %v694_v40, %v694_v40 }
  0xd5   :  { %v380_v43 = vpop.f32.mrf.mxu1 }
  0xd6   :  { %v557_v45 = vadd.f32 %v556_v42, %v542_v39  ;;  %445 = vst [vmem:[%s970_s5 + $0x28] sm:$0xff] %v380_v43  ;;  %v520_v46 = vadd.f32 %v519_v41, %v380_v43  ;;  %v543_v47 = vmul.f32 %v380_v43, %v380_v43  ;;  %v671_v52 = vpop.f32.mrf.mxu0 }
  0xd7   :  { %v697_v48 = vpop.f32.mrf.mxu1  ;;  %426 = vst [vmem:[%s971_s4 + $0x10] sm:$0xff] %v671_v52  ;;  %v480_v12 = vmul.f32 %v671_v52, %v671_v52 }
  0xd8   :  { %v521_v50 = vadd.f32 %v693_v32, %v520_v46  ;;  %v558_v51 = vadd.f32 %v557_v45, %v543_v47  ;;  %450 = vst [vmem:[%s970_s5 + $0x50] sm:$0xff] %v697_v48  ;;  %v179_v55 = vpop.f32.mrf.mxu0  ;;  %v548_v63 = vmul.f32 %v697_v48, %v697_v48 }
  0xd9   :  { %v393_v53 = vpop.f32.mrf.mxu1  ;;  %424 = vst [vmem:[%s971_s4] sm:$0xff] %v179_v55  ;;  %v478_v4 = vmul.f32 %v179_v55, %v179_v55 }
  0xda   :  { %v559_v54 = vadd.f32 %v558_v51, %v544_v44  ;;  %448 = vst [vmem:[%s970_s5 + $0x40] sm:$0xff] %v393_v53  ;;  %v522_v56 = vadd.f32 %v694_v40, %v521_v50  ;;  %v546_v57 = vmul.f32 %v393_v53, %v393_v53  ;;  %v672_v61 = vpop.f32.mrf.mxu0 }
  0xdb   :  { %v698_v58 = vpop.f32.mrf.mxu1  ;;  %427 = vst [vmem:[%s971_s4 + $0x18] sm:$0xff] %v672_v61  ;;  %v481_v20 = vmul.f32 %v672_v61, %v672_v61 }
  0xdc   :  { %v523_v59 = vadd.f32 %v522_v56, %v393_v53  ;;  %v560_v60 = vadd.f32 %v559_v54, %v545_v49  ;;  %451 = vst [vmem:[%s970_s5 + $0x58] sm:$0xff] %v698_v58  ;;  %v182_v1 = vpop.f32.mrf.mxu0  ;;  %v549_v8 = vmul.f32 %v698_v58, %v698_v58 }
  0xdd   :  { %v396_v62 = vpop.f32.mrf.mxu1  ;;  %425 = vst [vmem:[%s971_s4 + $0x8] sm:$0xff] %v182_v1  ;;  %v456_v5 = vadd.f32 %v182_v1, %v179_v55  ;;  %v479_v6 = vmul.f32 %v182_v1, %v182_v1 }
  0xde   :  { %v561_v0 = vadd.f32 %v560_v60, %v546_v57  ;;  %449 = vst [vmem:[%s970_s5 + $0x48] sm:$0xff] %v396_v62  ;;  %v524_v2 = vadd.f32 %v523_v59, %v396_v62  ;;  %v547_v3 = vmul.f32 %v396_v62, %v396_v62  ;;  %v675_v11 = vpop.f32.mrf.mxu0 }
  0xdf   :  { %v701_v7 = vpop.f32.mrf.mxu1  ;;  %v457_v13 = vadd.f32 %v671_v52, %v456_v5  ;;  %v494_v14 = vadd.f32 %v479_v6, %v478_v4  ;;  %430 = vst [vmem:[%s971_s4 + $0x30] sm:$0xff] %v675_v11  ;;  %v484_v43 = vmul.f32 %v675_v11, %v675_v11 }
  0xe0   :  { %v525_v9 = vadd.f32 %v697_v48, %v524_v2  ;;  %v562_v10 = vadd.f32 %v561_v0, %v547_v3  ;;  %454 = vst [vmem:[%s970_s5 + $0x70] sm:$0xff] %v701_v7  ;;  %v195_v17 = vpop.f32.mrf.mxu0  ;;  %v552_v31 = vmul.f32 %v701_v7, %v701_v7 }
  0xe1   :  { %v409_v15 = vpop.f32.mrf.mxu1  ;;  %v495_v21 = vadd.f32 %v494_v14, %v480_v12  ;;  %428 = vst [vmem:[%s971_s4 + $0x20] sm:$0xff] %v195_v17  ;;  %v458_v22 = vadd.f32 %v672_v61, %v457_v13  ;;  %v482_v28 = vmul.f32 %v195_v17, %v195_v17 }
  0xe2   :  { %v563_v16 = vadd.f32 %v562_v10, %v548_v63  ;;  %452 = vst [vmem:[%s970_s5 + $0x60] sm:$0xff] %v409_v15  ;;  %v526_v18 = vadd.f32 %v698_v58, %v525_v9  ;;  %v550_v19 = vmul.f32 %v409_v15, %v409_v15  ;;  %v676_v26 = vpop.f32.mrf.mxu0 }
  0xe3   :  { %v702_v23 = vpop.f32.mrf.mxu1  ;;  %v459_v27 = vadd.f32 %v458_v22, %v195_v17  ;;  %v496_v29 = vadd.f32 %v495_v21, %v481_v20  ;;  %431 = vst [vmem:[%s971_s4 + $0x38] sm:$0xff] %v676_v26  ;;  %v485_v49 = vmul.f32 %v676_v26, %v676_v26 }
  0xe4   :  { %v527_v24 = vadd.f32 %v526_v18, %v409_v15  ;;  %v564_v25 = vadd.f32 %v563_v16, %v549_v8  ;;  %455 = vst [vmem:[%s970_s5 + $0x78] sm:$0xff] %v702_v23  ;;  %v198_v33 = vpop.f32.mrf.mxu0  ;;  %v553_v39 = vmul.f32 %v702_v23, %v702_v23 }
  0xe5   :  { %v412_v30 = vpop.f32.mrf.mxu1  ;;  %v497_v36 = vadd.f32 %v496_v29, %v482_v28  ;;  %429 = vst [vmem:[%s971_s4 + $0x28] sm:$0xff] %v198_v33  ;;  %v460_v37 = vadd.f32 %v459_v27, %v198_v33  ;;  %v483_v38 = vmul.f32 %v198_v33, %v198_v33 }
  0xe6   :  { %v565_v32 = vadd.f32 %v564_v25, %v550_v19  ;;  %453 = vst [vmem:[%s970_s5 + $0x68] sm:$0xff] %v412_v30  ;;  %v528_v34 = vadd.f32 %v527_v24, %v412_v30  ;;  %v551_v35 = vmul.f32 %v412_v30, %v412_v30  ;;  %v679_v42 = vpop.f32.mrf.mxu0 }
  0xe7   :  { %v461_v44 = vadd.f32 %v675_v11, %v460_v37  ;;  %v498_v45 = vadd.f32 %v497_v36, %v483_v38  ;;  %434 = vst [vmem:[%s971_s4 + $0x50] sm:$0xff] %v679_v42  ;;  %v488_v3 = vmul.f32 %v679_v42, %v679_v42 }
  0xe8   :  { %v529_v40 = vadd.f32 %v701_v7, %v528_v34  ;;  %v566_v41 = vadd.f32 %v565_v32, %v551_v35  ;;  %v211_v48 = vpop.f32.mrf.mxu0 }
  0xe9   :  { %v499_v50 = vadd.f32 %v498_v45, %v484_v43  ;;  %432 = vst [vmem:[%s971_s4 + $0x40] sm:$0xff] %v211_v48  ;;  %v462_v51 = vadd.f32 %v676_v26, %v461_v44  ;;  %v486_v56 = vmul.f32 %v211_v48, %v211_v48 }
  0xea   :  { %v530_v46 = vadd.f32 %v702_v23, %v529_v40  ;;  %v567_v47 = vadd.f32 %v566_v41, %v552_v31  ;;  %v680_v54 = vpop.f32.mrf.mxu0 }
  0xeb   :  { %v463_v55 = vadd.f32 %v462_v51, %v211_v48  ;;  %v500_v57 = vadd.f32 %v499_v50, %v485_v49  ;;  %435 = vst [vmem:[%s971_s4 + $0x58] sm:$0xff] %v680_v54  ;;  %v489_v9 = vmul.f32 %v680_v54, %v680_v54 }
  0xec   :  { %v531_v52 = vrot.slane %v530_v46, 4  ;;  %v568_v53 = vadd.f32 %v567_v47, %v553_v39  ;;  %v214_v60 = vpop.f32.mrf.mxu0 }
  0xed   :  { %v501_v61 = vadd.f32 %v500_v57, %v486_v56  ;;  %433 = vst [vmem:[%s971_s4 + $0x48] sm:$0xff] %v214_v60  ;;  %v464_v62 = vadd.f32 %v463_v55, %v214_v60  ;;  %v487_v63 = vmul.f32 %v214_v60, %v214_v60 }
  0xee   :  { %v532_v58 = vadd.f32 %v531_v52, %v530_v46  ;;  %v569_v59 = vrot.slane %v568_v53, 4  ;;  %v683_v2 = vpop.f32.mrf.mxu0 }
  0xef   :  { %v465_v4 = vadd.f32 %v679_v42, %v464_v62  ;;  %v502_v5 = vadd.f32 %v501_v61, %v487_v63  ;;  %438 = vst [vmem:[%s971_s4 + $0x70] sm:$0xff] %v683_v2  ;;  %v492_v25 = vmul.f32 %v683_v2, %v683_v2 }
  0xf0   :  { %v533_v0 = vrot.slane %v532_v58, 2  ;;  %v570_v1 = vadd.f32 %v569_v59, %v568_v53  ;;  %v227_v8 = vpop.f32.mrf.mxu0 }
  0xf1   :  { %v503_v10 = vadd.f32 %v502_v5, %v488_v3  ;;  %436 = vst [vmem:[%s971_s4 + $0x60] sm:$0xff] %v227_v8  ;;  %v466_v11 = vadd.f32 %v680_v54, %v465_v4  ;;  %v490_v16 = vmul.f32 %v227_v8, %v227_v8 }
  0xf2   :  { %v534_v6 = vadd.f32 %v533_v0, %v532_v58  ;;  %v571_v7 = vrot.slane %v570_v1, 2  ;;  %v684_v14 = vpop.f32.mrf.mxu0 }
  0xf3   :  { %v467_v15 = vadd.f32 %v466_v11, %v227_v8  ;;  %v504_v17 = vadd.f32 %v503_v10, %v489_v9  ;;  %439 = vst [vmem:[%s971_s4 + $0x78] sm:$0xff] %v684_v14  ;;  %v493_v28 = vmul.f32 %v684_v14, %v684_v14 }
  0xf4   :  { %v535_v12 = vrot.slane %v534_v6, 1  ;;  %v572_v13 = vadd.f32 %v571_v7, %v570_v1  ;;  %v230_v20 = vpop.f32.mrf.mxu0 }
  0xf5   :  { %v505_v21 = vadd.f32 %v504_v17, %v490_v16  ;;  %437 = vst [vmem:[%s971_s4 + $0x68] sm:$0xff] %v230_v20  ;;  %v468_v22 = vadd.f32 %v467_v15, %v230_v20  ;;  %v491_v23 = vmul.f32 %v230_v20, %v230_v20 }
  0xf6   :  { %v536_v18 = vadd.f32 %v535_v12, %v534_v6  ;;  %v573_v19 = vrot.slane %v572_v13, 1 }
  0xf7   :  { %v469_v26 = vadd.f32 %v683_v2, %v468_v22  ;;  %v506_v27 = vadd.f32 %v505_v21, %v491_v23 }
  0xf8   :  { %537 = vst [vmem:[%s972_s8] sm:$0x1] %v536_v18  ;;  %v574_v24 = vadd.f32 %v573_v19, %v572_v13 }
  0xf9   :  { %v470_v29 = vadd.f32 %v684_v14, %v469_v26  ;;  %v507_v30 = vadd.f32 %v506_v27, %v492_v25 }
  0xfa   :  { %575 = vst [vmem:[%s973_s9] sm:$0x1] %v574_v24 }
  0xfb   :  { %v471_v31 = vrot.slane %v470_v29, 4  ;;  %v508_v32 = vadd.f32 %v507_v30, %v493_v28 }
  0xfd   :  { %v472_v33 = vadd.f32 %v471_v31, %v470_v29  ;;  %v509_v34 = vrot.slane %v508_v32, 4 }
  0xff   :  { %v473_v35 = vrot.slane %v472_v33, 2  ;;  %v510_v36 = vadd.f32 %v509_v34, %v508_v32 }
 0x101   :  { %v474_v37 = vadd.f32 %v473_v35, %v472_v33  ;;  %v511_v38 = vrot.slane %v510_v36, 2 }
 0x103   :  { %v475_v39 = vrot.slane %v474_v37, 1  ;;  %v512_v40 = vadd.f32 %v511_v38, %v510_v36 }
 0x105   :  { %v476_v41 = vadd.f32 %v475_v39, %v474_v37  ;;  %v513_v42 = vrot.slane %v512_v40, 1 }
 0x107   :  { %477 = vst [vmem:[%s974_s6] sm:$0x1] %v476_v41  ;;  %v514_v43 = vadd.f32 %v513_v42, %v512_v40 }
 0x109   :  { %515 = vst [vmem:[%s975_s7] sm:$0x1] %v514_v43 }

// kernel: encoder_forward.12
= control target key start
LH: loop header
LB: loop body
LE: loop exit
PB: predicated region body
PF: predicated region fallthrough
CT: control target
= control target key end

     0   :  { %vm132_vm0 = vcmask 1043456   ;;  %vm107_vm1 = vcmask 588800   ;;  %s532_s1 = inlined_call_operand.vmem [shape: bf16[72,128], index: 1, kind: input, shape index: {}]   ;;  %s533_s0 = inlined_call_operand.vmem [shape: bf16[128,72], index: 0, kind: input, shape index: {}]   ;;  %s534_s2 = inlined_call_operand.vmem [shape: f32[128,128], index: 2, kind: output, shape index: {0}]   ;;  %s535_s3 = inlined_call_operand.vmem [shape: f32[1,1,128], index: 3, kind: output, shape index: {1}]   ;;  %s536_s4 = inlined_call_operand.vmem [shape: f32[1,1,128], index: 4, kind: output, shape index: {2}]  }
   0x1   :  { %v393_v0 = vld [vmem:[%s532_s1 + $0x20] ss:$0 sps:$4 sm:$0xff]   ;;  %v394_v1 = vld [vmem:[%s532_s1 + $0x18] sm:$0xff]   ;;  %v395_v3 = vld [vmem:[%s532_s1 + $0x10] sm:$0xff]  }
   0x2   :  { %391 = vmatprep.subr.msk.bf16.mxu0 %vm132_vm0, %v393_v0  ;;  %v134_v2 = vsel %vm132_vm0, %v393_v0, 0  ;;  %392 = vmatprep.subr.msk.bf16.mxu1 %vm132_vm0, %v393_v0  ;;  %v398_v4 = vld [vmem:[%s533_s0] sm:$0xff]   ;;  %v396_v5 = vld [vmem:[%s532_s1 + $0x8] sm:$0xff]   ;;  %v400_v10 = vld [vmem:[%s533_s0 + $0x10] sm:$0xff]  }
   0x3   :  { %356 = vmatpush3.bf16.msra.mxu0 %v134_v2  ;;  %386 = vmatpush3.bf16.msra.mxu1 %v134_v2  ;;  %v402_v6 = vld [vmem:[%s533_s0 + $0x20] sm:$0xff]   ;;  %v399_v8 = vld [vmem:[%s533_s0 + $0x8] sm:$0xff]   ;;  %v404_v11 = vld [vmem:[%s533_s0 + $0x30] sm:$0xff]  }
   0x4   :  { %357 = vmatprep.subr.bf16.mxu0 %v394_v1  ;;  %382 = vmatprep.subr.bf16.mxu1 %v394_v1  ;;  %v397_v7 = vld [vmem:[%s532_s1] sm:$0xff]   ;;  %v403_v9 = vld [vmem:[%s533_s0 + $0x28] sm:$0xff]   ;;  %v401_v12 = vld [vmem:[%s533_s0 + $0x18] sm:$0xff]  }
   0x5   :  { %365 = vmatprep.mubr.msk.bf16.mxu0 %vm107_vm1, %v398_v4  ;;  %373 = vmatprep.mubr.msk.bf16.mxu1 %vm107_vm1, %v402_v6  ;;  %v405_v13 = vld [vmem:[%s533_s0 + $0x38] sm:$0xff]  }
   0x7   :  { %358 = vmatpush3.bf16.msra.mxu0 %v394_v1  ;;  %387 = vmatpush3.bf16.msra.mxu1 %v394_v1 }
   0x8   :  { %359 = vmatprep.subr.bf16.mxu0 %v395_v3  ;;  %383 = vmatprep.subr.bf16.mxu1 %v395_v3 }
   0xb   :  { %360 = vmatpush3.bf16.msra.mxu0 %v395_v3  ;;  %388 = vmatpush3.bf16.msra.mxu1 %v395_v3 }
   0xc   :  { %361 = vmatprep.subr.bf16.mxu0 %v396_v5  ;;  %384 = vmatprep.subr.bf16.mxu1 %v396_v5 }
   0xf   :  { %362 = vmatpush3.bf16.msra.mxu0 %v396_v5  ;;  %389 = vmatpush3.bf16.msra.mxu1 %v396_v5 }
  0x10   :  { %363 = vmatprep.subr.bf16.mxu0 %v397_v7  ;;  %385 = vmatprep.subr.bf16.mxu1 %v397_v7 }
  0x13   :  { %364 = vmatpush3.bf16.msra.mxu0 %v397_v7  ;;  %390 = vmatpush3.bf16.msra.mxu1 %v397_v7 }
  0x16   :  { %366 = vmatmul.mubr.msk.bf16.vlgmr.msra.gmra.mxu0 %vm107_vm1, %v399_v8  ;;  %374 = vmatmul.mubr.msk.bf16.vlgmr.msra.gmra.mxu1 %vm107_vm1, %v403_v9 }
  0x17   :  { %369 = vmatprep.mubr.msk.bf16.mxu0 %vm107_vm1, %v400_v10  ;;  %377 = vmatprep.mubr.msk.bf16.mxu1 %vm107_vm1, %v404_v11 }
  0x1e   :  { %370 = vmatmul.mubr.msk.bf16.gmra.mxu0 %vm107_vm1, %v401_v12  ;;  %378 = vmatmul.mubr.msk.bf16.gmra.mxu1 %vm107_vm1, %v405_v13 }
  0xd6   :  { %v367_v14 = vpop.f32.mrf.mxu0  ;;  %v375_v15 = vpop.f32.mrf.mxu1 }
  0xd7   :  { %235 = vst [vmem:[%s534_s2 + $0x10] sm:$0xff] %v367_v14  ;;  %243 = vst [vmem:[%s534_s2 + $0x50] sm:$0xff] %v375_v15  ;;  %v273_v27 = vmul.f32 %v367_v14, %v367_v14  ;;  %v281_v57 = vmul.f32 %v375_v15, %v375_v15 }
  0xd8   :  { %v170_v16 = vpop.f32.mrf.mxu0  ;;  %v202_v17 = vpop.f32.mrf.mxu1 }
  0xd9   :  { %233 = vst [vmem:[%s534_s2] sm:$0xff] %v170_v16  ;;  %241 = vst [vmem:[%s534_s2 + $0x40] sm:$0xff] %v202_v17  ;;  %v271_v22 = vmul.f32 %v170_v16, %v170_v16  ;;  %v279_v51 = vmul.f32 %v202_v17, %v202_v17 }
  0xda   :  { %v368_v18 = vpop.f32.mrf.mxu0  ;;  %v376_v19 = vpop.f32.mrf.mxu1 }
  0xdb   :  { %236 = vst [vmem:[%s534_s2 + $0x18] sm:$0xff] %v368_v18  ;;  %244 = vst [vmem:[%s534_s2 + $0x58] sm:$0xff] %v376_v19  ;;  %v274_v32 = vmul.f32 %v368_v18, %v368_v18  ;;  %v282_v60 = vmul.f32 %v376_v19, %v376_v19 }
  0xdc   :  { %v173_v20 = vpop.f32.mrf.mxu0  ;;  %v205_v21 = vpop.f32.mrf.mxu1 }
  0xdd   :  { %234 = vst [vmem:[%s534_s2 + $0x8] sm:$0xff] %v173_v20  ;;  %v249_v23 = vadd.f32 %v173_v20, %v170_v16  ;;  %v272_v24 = vmul.f32 %v173_v20, %v173_v20  ;;  %242 = vst [vmem:[%s534_s2 + $0x48] sm:$0xff] %v205_v21  ;;  %v280_v55 = vmul.f32 %v205_v21, %v205_v21 }
  0xde   :  { %v371_v25 = vpop.f32.mrf.mxu0  ;;  %v379_v26 = vpop.f32.mrf.mxu1 }
  0xdf   :  { %v250_v28 = vadd.f32 %v367_v14, %v249_v23  ;;  %v287_v29 = vadd.f32 %v272_v24, %v271_v22  ;;  %239 = vst [vmem:[%s534_s2 + $0x30] sm:$0xff] %v371_v25  ;;  %247 = vst [vmem:[%s534_s2 + $0x70] sm:$0xff] %v379_v26  ;;  %v277_v45 = vmul.f32 %v371_v25, %v371_v25 }
  0xe0   :  { %v186_v30 = vpop.f32.mrf.mxu0  ;;  %v218_v31 = vpop.f32.mrf.mxu1  ;;  %v285_v5 = vmul.f32 %v379_v26, %v379_v26 }
  0xe1   :  { %v288_v33 = vadd.f32 %v287_v29, %v273_v27  ;;  %237 = vst [vmem:[%s534_s2 + $0x20] sm:$0xff] %v186_v30  ;;  %v251_v34 = vadd.f32 %v368_v18, %v250_v28  ;;  %245 = vst [vmem:[%s534_s2 + $0x60] sm:$0xff] %v218_v31  ;;  %v275_v38 = vmul.f32 %v186_v30, %v186_v30 }
  0xe2   :  { %v372_v35 = vpop.f32.mrf.mxu0  ;;  %v380_v36 = vpop.f32.mrf.mxu1  ;;  %v283_v0 = vmul.f32 %v218_v31, %v218_v31 }
  0xe3   :  { %v252_v37 = vadd.f32 %v251_v34, %v186_v30  ;;  %v289_v39 = vadd.f32 %v288_v33, %v274_v32  ;;  %240 = vst [vmem:[%s534_s2 + $0x38] sm:$0xff] %v372_v35  ;;  %248 = vst [vmem:[%s534_s2 + $0x78] sm:$0xff] %v380_v36  ;;  %v278_v48 = vmul.f32 %v372_v35, %v372_v35 }
  0xe4   :  { %v189_v40 = vpop.f32.mrf.mxu0  ;;  %v221_v41 = vpop.f32.mrf.mxu1  ;;  %v286_v8 = vmul.f32 %v380_v36, %v380_v36 }
  0xe5   :  { %v290_v42 = vadd.f32 %v289_v39, %v275_v38  ;;  %238 = vst [vmem:[%s534_s2 + $0x28] sm:$0xff] %v189_v40  ;;  %v253_v43 = vadd.f32 %v252_v37, %v189_v40  ;;  %v276_v44 = vmul.f32 %v189_v40, %v189_v40  ;;  %246 = vst [vmem:[%s534_s2 + $0x68] sm:$0xff] %v221_v41 }
  0xe6   :  { %v284_v4 = vmul.f32 %v221_v41, %v221_v41 }
  0xe7   :  { %v254_v46 = vadd.f32 %v371_v25, %v253_v43  ;;  %v291_v47 = vadd.f32 %v290_v42, %v276_v44 }
  0xe9   :  { %v255_v49 = vadd.f32 %v372_v35, %v254_v46  ;;  %v292_v50 = vadd.f32 %v291_v47, %v277_v45 }
  0xeb   :  { %v293_v52 = vadd.f32 %v292_v50, %v278_v48  ;;  %v256_v53 = vadd.f32 %v255_v49, %v202_v17 }
  0xed   :  { %v257_v54 = vadd.f32 %v256_v53, %v205_v21  ;;  %v294_v56 = vadd.f32 %v293_v52, %v279_v51 }
  0xef   :  { %v258_v58 = vadd.f32 %v375_v15, %v257_v54  ;;  %v295_v59 = vadd.f32 %v294_v56, %v280_v55 }
  0xf1   :  { %v296_v61 = vadd.f32 %v295_v59, %v281_v57  ;;  %v259_v62 = vadd.f32 %v376_v19, %v258_v58 }
  0xf3   :  { %v260_v63 = vadd.f32 %v259_v62, %v218_v31  ;;  %v297_v1 = vadd.f32 %v296_v61, %v282_v60 }
  0xf5   :  { %v298_v2 = vadd.f32 %v297_v1, %v283_v0  ;;  %v261_v3 = vadd.f32 %v260_v63, %v221_v41 }
  0xf7   :  { %v262_v6 = vadd.f32 %v379_v26, %v261_v3  ;;  %v299_v7 = vadd.f32 %v298_v2, %v284_v4 }
  0xf9   :  { %v263_v9 = vadd.f32 %v380_v36, %v262_v6  ;;  %v300_v10 = vadd.f32 %v299_v7, %v285_v5 }
  0xfb   :  { %v264_v11 = vrot.slane %v263_v9, 4  ;;  %v301_v12 = vadd.f32 %v300_v10, %v286_v8 }
  0xfd   :  { %v265_v13 = vadd.f32 %v264_v11, %v263_v9  ;;  %v302_v14 = vrot.slane %v301_v12, 4 }
  0xff   :  { %v266_v15 = vrot.slane %v265_v13, 2  ;;  %v303_v16 = vadd.f32 %v302_v14, %v301_v12 }
 0x101   :  { %v267_v17 = vadd.f32 %v266_v15, %v265_v13  ;;  %v304_v18 = vrot.slane %v303_v16, 2 }
 0x103   :  { %v268_v19 = vrot.slane %v267_v17, 1  ;;  %v305_v20 = vadd.f32 %v304_v18, %v303_v16 }
 0x105   :  { %v269_v21 = vadd.f32 %v268_v19, %v267_v17  ;;  %v306_v22 = vrot.slane %v305_v20, 1 }
 0x107   :  { %270 = vst [vmem:[%s535_s3] sm:$0x1] %v269_v21  ;;  %v307_v23 = vadd.f32 %v306_v22, %v305_v20 }
 0x109   :  { %308 = vst [vmem:[%s536_s4] sm:$0x1] %v307_v23 }

</bundles_post_ra>
